<compile_context>
chip_gen: v5e
topology: v5e:2x2
jax: 0.10.0
libtpu: 0.0.40
codegen_flags: <defaults>
</compile_context>

<pallas_src>
import jax
import jax.numpy as jnp
from jax import lax
from jax.experimental import pallas as pl
from jax.experimental.pallas import tpu as pltpu


def _round_up(n, m):
    return ((n + m - 1) // m) * m


def mlp_logsoftmax_kernel(x_ref, w1_ref, b1_ref, w2t_ref, b2t_ref, out_ref):
    # x arrives f32 straight from HBM; cast to bf16 in VMEM immediately before
    # the MXU op (no standalone XLA cast, no extra HBM round-trip).
    x = x_ref[...].astype(jnp.bfloat16)

    # Hidden layer: (tb,784)bf16 @ (784,64)bf16 -> f32 accum; bias+ReLU in f32.
    h = jnp.dot(x, w1_ref[...], preferred_element_type=jnp.float32)
    h = jnp.maximum(h + b1_ref[...], 0.0)

    # Output layer, TRANSPOSED: logits_t[c, b] = sum_k w2[k, c] * h[b, k].
    # Batch lives on the lane axis -> the log-softmax epilogue is lane-dense
    # (~16 vregs/tile instead of ~tb/8 lane-sparse ones) and the output store
    # is a dense vst.
    logits_t = lax.dot_general(
        w2t_ref[...], h.astype(jnp.bfloat16),
        dimension_numbers=(((1,), (1,)), ((), ())),
        preferred_element_type=jnp.float32)              # (ncls, tb)
    logits_t = logits_t + b2t_ref[...]                   # b2t: (ncls, 1)

    # LogSoftmax over the class (sublane) axis, f32.
    m = jnp.max(logits_t, axis=0, keepdims=True)
    shifted = logits_t - m
    lse = jnp.log(jnp.sum(jnp.exp(shifted), axis=0, keepdims=True))
    out_ref[...] = shifted - lse


def _choose_tb(batch, tb_max):
    """Pick the batch tile.

    * Multiple of 128 so the transposed (ncls, tb) output blocks are
      lane-dense and partial-last-block shapes stay legal.
    * At least 2 grid steps when there is enough work, so a v7x chip can shard
      the "parallel" batch axis across both TensorCores.
    * Capped at tb_max (default 1024 keeps the f32 x double-buffer well inside
      the scoped-VMEM defaults on v5e/v6e/v7x).
    """
    if batch <= 128:
        return batch  # single block; every block dim equals the array dim
    half = _round_up(pl.cdiv(batch, 2), 128)
    return max(128, min(tb_max, half))


def neural_network_forward(x, w1, b1, w2, b2, *, tb=1024):
    """Forward pass of the 784->64->10 MLP with log-softmax output.

    x: (B, 784); w1: (784, 64); b1: (1, 64); w2: (64, 10); b2: (1, 10).
    Returns (B, 10) float32 log-probabilities.
    """
    B, in_dim = x.shape
    hid = w1.shape[1]
    ncls = w2.shape[1]

    tb = _choose_tb(B, tb)
    grid = (pl.cdiv(B, tb),)

    # Weights/biases are tiny; restructure/cast them once.  x is NOT cast or
    # padded in the wrapper -- the ragged last tile is handled by Pallas
    # partial-block semantics (garbage tail reads never cross batch elements,
    # tail writes are dropped).
    w1b = w1.astype(jnp.bfloat16)                     # (784, 64)
    w2t = w2.T.astype(jnp.bfloat16)                   # (10, 64)
    b1f = b1.reshape(1, hid).astype(jnp.float32)      # (1, 64)
    b2t = b2.reshape(ncls, 1).astype(jnp.float32)     # (10, 1)

    weight_bytes = (in_dim * hid + hid * ncls) * 2 + (hid + ncls) * 4
    cost = pl.CostEstimate(
        flops=2 * B * (in_dim * hid + hid * ncls),
        transcendentals=B * (ncls + 1),
        bytes_accessed=B * in_dim * x.dtype.itemsize + B * ncls * 4 + weight_bytes,
    )

    out_t = pl.pallas_call(
        mlp_logsoftmax_kernel,
        out_shape=jax.ShapeDtypeStruct((ncls, B), jnp.float32),
        grid=grid,
        in_specs=[
            pl.BlockSpec((tb, in_dim), lambda i: (i, 0)),    # x tile (pipelined)
            pl.BlockSpec((in_dim, hid), lambda i: (0, 0)),   # w1   (VMEM-resident)
            pl.BlockSpec((1, hid), lambda i: (0, 0)),        # b1   (VMEM-resident)
            pl.BlockSpec((ncls, hid), lambda i: (0, 0)),     # w2^T (VMEM-resident)
            pl.BlockSpec((ncls, 1), lambda i: (0, 0)),       # b2^T (VMEM-resident)
        ],
        out_specs=pl.BlockSpec((ncls, tb), lambda i: (0, i)),
        compiler_params=pltpu.CompilerParams(
            dimension_semantics=("parallel",),
        ),
        cost_estimate=cost,
    )(x, w1b, b1f, w2t, b2t)

    # Tiny (10, B) -> (B, 10) transpose in the wrapper (~40 B/row, negligible
    # next to the ~3.1 KB/row x stream).
    return out_t.T


def init_params(key):
    # Mimic PyTorch's default Linear init: uniform in [-1/sqrt(fan_in), +...].
    k1, k2, k3, k4 = jax.random.split(key, 4)
    bound1 = 1.0 / jnp.sqrt(784.0)
    bound2 = 1.0 / jnp.sqrt(64.0)
    w1 = jax.random.uniform(k1, (784, 64), jnp.float32, -bound1, bound1)
    b1 = jax.random.uniform(k2, (1, 64), jnp.float32, -bound1, bound1)
    w2 = jax.random.uniform(k3, (64, 10), jnp.float32, -bound2, bound2)
    b2 = jax.random.uniform(k4, (1, 10), jnp.float32, -bound2, bound2)
    return w1, b1, w2, b2


def reference_forward(x, w1, b1, w2, b2):
    h = jnp.maximum(x @ w1 + b1, 0.0)
    logits = h @ w2 + b2
    return jax.nn.log_softmax(logits, axis=-1)


if __name__ == "__main__":
    key = jax.random.PRNGKey(0)
    kx, kp = jax.random.split(key)

    # Not a multiple of the tile: exercises the 2-step grid + a partial last
    # block (tb=256 -> last tile has 44 valid rows, tail writes dropped).
    B = 300
    x = jax.random.normal(kx, (B, 784), jnp.float32)
    w1, b1, w2, b2 = init_params(kp)

    out = neural_network_forward(x, w1, b1, w2, b2)
    out = jax.block_until_ready(out)

    ref = reference_forward(x, w1, b1, w2, b2)
    assert out.shape == (B, 10)
    assert out.dtype == jnp.float32
    # bf16 MXU operands -> loose tolerance vs the f32 reference.
    assert jnp.allclose(out, ref, atol=3e-2, rtol=3e-2)
    # Rows are valid log-probabilities (logsumexp over classes == 0).
    assert jnp.allclose(jax.scipy.special.logsumexp(out, axis=-1), 0.0, atol=1e-4)

    print("KERNEL_OK")
</pallas_src>

<mosaic_0001>
module attributes {stable_mosaic.version = 11 : i64} {
  func.func @mlp_logsoftmax_kernel(%arg0: i32, %arg1: memref<256x784xf32, #tpu.memory_space<vmem>>, %arg2: memref<784x64xbf16, #tpu.memory_space<vmem>>, %arg3: memref<1x64xf32, #tpu.memory_space<vmem>>, %arg4: memref<10x64xbf16, #tpu.memory_space<vmem>>, %arg5: memref<10x1xf32, #tpu.memory_space<vmem>>, %arg6: memref<10x256xf32, #tpu.memory_space<vmem>>) attributes {dimension_semantics = [#tpu.dimension_semantics<parallel>], iteration_bounds = array<i64: 2>, scalar_prefetch = 0 : i64, scratch_operands = 0 : i64, tpu.core_type = #tpu.core_type<tc>, window_params = [{transform_indices = @transform_0, window_bounds = array<i64: 256, 784>}, {pipeline_mode = #tpu.pipeline_mode<synchronous>, transform_indices = @transform_1, window_bounds = array<i64: 784, 64>}, {pipeline_mode = #tpu.pipeline_mode<synchronous>, transform_indices = @transform_2, window_bounds = array<i64: 1, 64>}, {pipeline_mode = #tpu.pipeline_mode<synchronous>, transform_indices = @transform_3, window_bounds = array<i64: 10, 64>}, {pipeline_mode = #tpu.pipeline_mode<synchronous>, transform_indices = @transform_4, window_bounds = array<i64: 10, 1>}, {transform_indices = @transform_5, window_bounds = array<i64: 10, 256>}]} {
    %c0 = arith.constant 0 : index
    %c0_0 = arith.constant 0 : index
    %0 = vector.load %arg1[%c0, %c0_0] : memref<256x784xf32, #tpu.memory_space<vmem>>, vector<256x784xf32>
    %1 = arith.truncf %0 : vector<256x784xf32> to vector<256x784xbf16>
    %c0_1 = arith.constant 0 : index
    %c0_2 = arith.constant 0 : index
    %2 = vector.load %arg2[%c0_1, %c0_2] : memref<784x64xbf16, #tpu.memory_space<vmem>>, vector<784x64xbf16>
    %cst = arith.constant dense<0.000000e+00> : vector<256x64xf32>
    %3 = tpu.matmul %1, %2, %cst {dimension_numbers = #tpu.dot_dimension_numbers<[1], [0], [0], [1], [0, 0, 1, 1], [], []>} : vector<256x784xbf16>, vector<784x64xbf16>, vector<256x64xf32> -> vector<256x64xf32>
    %c0_3 = arith.constant 0 : index
    %c0_4 = arith.constant 0 : index
    %4 = vector.load %arg3[%c0_3, %c0_4] : memref<1x64xf32, #tpu.memory_space<vmem>>, vector<1x64xf32>
    %5 = vector.broadcast %4 : vector<1x64xf32> to vector<256x64xf32>
    %6 = arith.addf %3, %5 : vector<256x64xf32>
    %cst_5 = arith.constant 0.000000e+00 : f32
    %7 = vector.broadcast %cst_5 : f32 to vector<256x64xf32>
    %8 = arith.maximumf %6, %7 : vector<256x64xf32>
    %c0_6 = arith.constant 0 : index
    %c0_7 = arith.constant 0 : index
    %9 = vector.load %arg4[%c0_6, %c0_7] : memref<10x64xbf16, #tpu.memory_space<vmem>>, vector<10x64xbf16>
    %10 = arith.truncf %8 : vector<256x64xf32> to vector<256x64xbf16>
    %cst_8 = arith.constant dense<0.000000e+00> : vector<10x256xf32>
    %11 = tpu.matmul %9, %10, %cst_8 {dimension_numbers = #tpu.dot_dimension_numbers<[1], [1], [0], [0], [0, 0, 1, 0], [], []>} : vector<10x64xbf16>, vector<256x64xbf16>, vector<10x256xf32> -> vector<10x256xf32>
    %c0_9 = arith.constant 0 : index
    %c0_10 = arith.constant 0 : index
    %12 = vector.load %arg5[%c0_9, %c0_10] : memref<10x1xf32, #tpu.memory_space<vmem>>, vector<10x1xf32>
    %13 = vector.broadcast %12 : vector<10x1xf32> to vector<10x256xf32>
    %14 = arith.addf %11, %13 : vector<10x256xf32>
    %cst_11 = arith.constant dense<0xFF800000> : vector<256xf32>
    %15 = vector.multi_reduction <maximumf>, %14, %cst_11 [0] : vector<10x256xf32> to vector<256xf32>
    %16 = vector.shape_cast %15 : vector<256xf32> to vector<1x256xf32>
    %17 = vector.broadcast %16 : vector<1x256xf32> to vector<10x256xf32>
    %18 = arith.subf %14, %17 : vector<10x256xf32>
    %19 = math.exp %18 : vector<10x256xf32>
    %cst_12 = arith.constant dense<0.000000e+00> : vector<256xf32>
    %20 = vector.multi_reduction <add>, %19, %cst_12 [0] : vector<10x256xf32> to vector<256xf32>
    %21 = vector.shape_cast %20 : vector<256xf32> to vector<1x256xf32>
    %22 = math.log %21 : vector<1x256xf32>
    %23 = vector.broadcast %22 : vector<1x256xf32> to vector<10x256xf32>
    %24 = arith.subf %18, %23 : vector<10x256xf32>
    %c0_13 = arith.constant 0 : index
    %c0_14 = arith.constant 0 : index
    %25 = vector.load %arg6[%c0_13, %c0_14] : memref<10x256xf32, #tpu.memory_space<vmem>>, vector<10x256xf32>
    tpu.vector_store %arg6[%c0_13, %c0_14], %24 {strides = array<i32>} : memref<10x256xf32, #tpu.memory_space<vmem>>, vector<10x256xf32>,
    return
  }
  func.func @transform_0(%arg0: i32) -> (i32, i32) {
    %c0_i32 = arith.constant 0 : i32
    %c0_i32_0 = arith.constant 0 : i32
    return %arg0, %c0_i32 : i32, i32
  }
  func.func @transform_1(%arg0: i32) -> (i32, i32) {
    %c0_i32 = arith.constant 0 : i32
    %c0_i32_0 = arith.constant 0 : i32
    %c0_i32_1 = arith.constant 0 : i32
    return %c0_i32, %c0_i32_0 : i32, i32
  }
  func.func @transform_2(%arg0: i32) -> (i32, i32) {
    %c0_i32 = arith.constant 0 : i32
    %c0_i32_0 = arith.constant 0 : i32
    %c0_i32_1 = arith.constant 0 : i32
    return %c0_i32, %c0_i32_0 : i32, i32
  }
  func.func @transform_3(%arg0: i32) -> (i32, i32) {
    %c0_i32 = arith.constant 0 : i32
    %c0_i32_0 = arith.constant 0 : i32
    %c0_i32_1 = arith.constant 0 : i32
    return %c0_i32, %c0_i32_0 : i32, i32
  }
  func.func @transform_4(%arg0: i32) -> (i32, i32) {
    %c0_i32 = arith.constant 0 : i32
    %c0_i32_0 = arith.constant 0 : i32
    %c0_i32_1 = arith.constant 0 : i32
    return %c0_i32, %c0_i32_0 : i32, i32
  }
  func.func @transform_5(%arg0: i32) -> (i32, i32) {
    %c0_i32 = arith.constant 0 : i32
    %c0_i32_0 = arith.constant 0 : i32
    return %c0_i32, %arg0 : i32, i32
  }
}

</mosaic_0001>

<bundles_post_ra>
// kernel: tpu_custom_call.1
= control target key start
LH: loop header
LB: loop body
LE: loop exit
PB: predicated region body
PF: predicated region fallthrough
CT: control target
= control target key end

     0   :  { %s3578_s0 = inlined_call_operand.hbm [shape: f32[300,784], index: 0, kind: input, shape index: {}]   ;;  %s3579_s1 = inlined_call_operand.vmem [shape: bf16[784,64], index: 1, kind: input, shape index: {}]   ;;  %s3580_s2 = inlined_call_operand.hbm [shape: f32[1,64], index: 2, kind: input, shape index: {}]   ;;  %s3581_s3 = inlined_call_operand.hbm [shape: bf16[10,64], index: 3, kind: input, shape index: {}]   ;;  %s3582_s4 = inlined_call_operand.vmem [shape: f32[10,1], index: 4, kind: input, shape index: {}]   ;;  %s3583_s5 = inlined_call_operand.hbm [shape: f32[10,300], index: 5, kind: output, shape index: {}]  }
   0x1   :  { %3588 = sst [smem:[#allocation13_spill]] %s3580_s2 }
   0x2   :  { %3589 = sst [smem:[#allocation14_spill]] %s3581_s3 }
   0x3   :  { %10 = vsyncpa [#allocation3], 0 }
   0x4   :  { %12 = vsyncpa [#allocation3 + $0x1], 0 }
   0x5   :  { %13 = vsyncpa [#allocation6], 0 }
   0x6   :  { %14 = vsyncpa [#allocation4], 0 }
   0x7   :  { %16 = vsyncpa [#allocation4 + $0x1], 0  ;;  %s2649_s18 = smov 0   ;;  %s2651_s19 = smov 0  }
   0x8   :  { %s2653_s20 = smov 0   ;;  %s2655_s21 = smov 0  }
   0x9 LB: > { %s2670_s22 = sadd.s32 4294967295, %s2606_s21   ;;  %s2021_s23 = sadd.s32 4294967294, %s2606_s21   ;;  %s2606_s21 = sphi %s2655_s21, %s3609_s21   ;;  %s2602_s20 = sphi %s2653_s20, %s3608_s20   ;;  %s2598_s19 = sphi %s2651_s19, %s3607_s19   ;;  %s2594_s18 = sphi %s2649_s18, %s3606_s18  }
   0xa   : > { %s2674_s24 = sadd.s32 1, %s2606_s21   ;;  %s29_s25 = sadd.s32 1, %s2602_s20 }
   0xb   : > { %s26_s26 = ssub.s32 %s2606_s21, %s2674_s24  ;;  %p36_p0 = scmp.ne.s32.totalorder %s2602_s20, %s2598_s19 }
   0xc   : > { %p27_p1 = scmp.eq.s32.totalorder %s26_s26, 0  ;;  %p37_p2 = scmp.eq.s32.totalorder %s2606_s21, 0 }
   0xd   : > { %p42_p3 = scmp.ne.s32.totalorder %s2598_s19, %s2594_s18  ;;  %p3587_p4 = scmp.eq.s32.totalorder %s2670_s22, 0 }
   0xe   : > { %s2686_s27 = scalar_select %p27_p1, %s2602_s20, %s29_s25  }
   0xf   : > { %p2688_p5 = por %p37_p2, %p36_p0  ;;  %p2694_p6 = por %p3587_p4, %p42_p3 }
  0x10   : > { %p150_p7 = scmp.eq.s32.totalorder %s2670_s22, 1  ;;  %p156_p8 = scmp.eq.s32.totalorder %s2021_s23, 1 }
  0x11   : > { %p2022_p9 = scmp.ge.s32.totalorder %s2606_s21, 1  ;;  %p163_p10 = scmp.lt.s32.totalorder %s2606_s21, 3 }
  0x12   : > { %p2701_p11 = por %p150_p7, %p36_p0  ;;  %p2705_p12 = por %p156_p8, %p42_p3 }
  0x13   : > { %p2709_p13 = pnand %p2022_p9, %p163_p10  ;;  %s3595_s2 = sld [smem:[#allocation13_spill]] }
  0x14   : > { %s3593_s6 = scalar_select %p2705_p12, 1, 0 }
  0x15   : > { %p2355_p1 = pneg %p2709_p13  ;;  %s2608_s11 = smov [#allocation5]  }
  0x16   : > { %s180_s12 = sshll.u32 %s2608_s11, 4  ;;  %s3596_s3 = sld [smem:[#allocation14_spill]]  ;;  %s181_s12 = int_to_ptr.vmem [resolvable:$true] %s180_s12 }
  0x17   : > { %p2356_p0 = pnand %p2355_p1, %p3587_p4  ;;  %s2609_s16 = smov [#allocation7]  }
  0x18   : > { %s191_s17 = sshll.u32 %s2609_s16, 4  ;;  %s2610_s23 = smov 64   ;;  %s192_s17 = int_to_ptr.vmem [resolvable:$true] %s191_s17 }
  0x19   : > { %s178_s10 = sshll.u32 %s3595_s2, 4  ;;  %s2611_s25 = smov 4   ;;  %s179_s10 = int_to_ptr.hbm [resolvable:$true] %s178_s10 }
  0x1a   : > { %2358 = dma.hbm_to_vmem [thread:$0]  (!%p2356_p0), %s179_s10, 16, %s181_s12, [#allocation6]  }
  0x1b   : > { %p3586_p2 = scmp.ge.s32.totalorder %s2606_s21, 2 }
  0x1c   : > { %s189_s15 = sshll.u32 %s3596_s3, 4  ;;  %s190_s15 = int_to_ptr.hbm [resolvable:$true] %s189_s15 }
  0x1d   : > { %2361 = dma.hbm_to_vmem [thread:$0]  (!%p2356_p0), %s190_s15, 128, %s192_s17, [#allocation6], %s2610_s23, %s2610_s23, %s2611_s25  }
  0x1e   : > { %204 = sbr.rel (%p3586_p2) target bundleno = 87 (0x57), region = 32 }
  0x23   : > { %207 = sbr.rel (!%p2688_p5) target bundleno = 87 (0x57), region = 36 }
  0x28   : > { %s208_s26 = sand.u32 1, %s2602_s20   ;;  %s2026_s8 = sshll.u32 %s2606_s21, 5 }
  0x29   : > { %s2342_s9 = smul.u32 1792, %s208_s26  ;;  %s214_s11 = ssub.s32 38, %s2026_s8 }
  0x2a   : > { %p215_p3 = scmp.lt.s32.totalorder %s214_s11, 32  ;;  %s2730_s14 = scalar_lea.sflag [#allocation3], %s208_s26 }
  0x2b   : > { %s212_s15 = scalar_lea.vmem [#allocation2], %s2342_s9 }
  0x2c   : > { %s3611_s11 = smov (!%p215_p3, %s214_s11), 32 }
  0x2d   : > { %s2028_s10 = smul.u32 56, %s3611_s11 }
  0x2f   : > { %s219_s12 = ssub.s32 1792, %s2028_s10 }
  0x30   : > { %s220_s13 = sshll.u32 %s219_s12, 4 }
  0x31   : > { %221 = vsyncadd %s2730_s14, %s220_s13  ;;  %p2733_p7 = scmp.ne.s32.totalorder %s2028_s10, 0  ;;  %s2343_s16 = smul.u32 1792, %s2606_s21 }
  0x32   : > { %s2738_s17 = sshll.u32 %s212_s15, 4  ;;  %s2740_s23 = smul.u32 896, %s3611_s11 }
  0x33   : > { %3598 = sst [smem:[#allocation12_spill]] %s2738_s17  ;;  %s225_s26 = scalar_lea.hbm %s3578_s0, %s2343_s16 }
  0x34   : > { %s227_s9 = sshll.u32 %s225_s26, 4  ;;  %s2488_s12 = sshrl.u32 %s2740_s23, 4  ;;  %s2746_s9 = int_to_ptr.hbm [resolvable:$true] %s227_s9 }
  0x35   : > { %s2486_s10 = sshra.s32 %s2746_s9, 4  ;;  %s2524_s13 = sshll.u32 %s2488_s12, 4  ;;  %s2487_s10 = int_to_ptr.hbm [resolvable:$true] %s2486_s10 }
  0x36   : > { %p2490_p5 = scmp.ne.s32.totalorder %s2524_s13, %s2740_s23  ;;  %s2491_s15 = sadd.s32 1, %s2488_s12 }
  0x37   : > { %s2497_s16 = scalar_lea.hbm %s3578_s0, 2128  ;;  %p2498_p1 = scmp.lt.s32.totalorder %s2487_s10, %s3578_s0 }
  0x38   : > { %s3613_s15 = smov (!%p2490_p5, %s2491_s15), %s2488_s12 }
  0x39   : > { %s2493_s11 = scalar_lea.hbm %s2487_s10, %s3613_s15 }
  0x3a   : > { %p2494_p8 = scmp.ne.s32.totalorder %s2487_s10, %s2493_s11  ;;  %p2499_p0 = scmp.lt.s32.totalorder %s2497_s16, %s2493_s11 }
  0x3c   : > { %p2495_p9 = pnand %p2494_p8, %p2733_p7  ;;  %p2500_p3 = por %p2499_p0, %p2498_p1 }
  0x3e   : > { %p2496_p10 = pneg %p2495_p9 }
  0x40   : > { %p2501_p2 = pnand %p2500_p3, %p2496_p10 }
  0x42   : > { %2504 = shalt.err (!%p2501_p2)
}
  0x43   : > { %s3599_s13 = sld [smem:[#allocation12_spill]]  ;;  %s2612_s25 = smov [#allocation2]  }
  0x44   : > { %s2516_s8 = scalar_lea.vmem %s2612_s25, 3584 }
  0x49   : > { %s3600_s2 = int_to_ptr.vmem [resolvable:$true] %s3599_s13 }
  0x4a   : > { %s2505_s12 = sshra.s32 %s3600_s2, 4  ;;  %s2506_s12 = int_to_ptr.vmem [resolvable:$true] %s2505_s12 }
  0x4b   : > { %s2512_s3 = scalar_lea.vmem %s2506_s12, %s3613_s15 }
  0x4c   : > { %p2513_p5 = scmp.ne.s32.totalorder %s2506_s12, %s2512_s3  ;;  %p2518_p4 = scmp.lt.s32.totalorder %s2516_s8, %s2512_s3 }
  0x4e   : > { %p2514_p8 = pnand %p2513_p5, %p2733_p7 }
  0x50   : > { %p2515_p9 = pneg %p2514_p8 }
  0x52   : > { %p2520_p12 = pnand %p2518_p4, %p2515_p9 }
  0x54   : > { %2523 = shalt.err (!%p2520_p12)
}
  0x55   : > { %s2613_s17 = smov 896   ;;  %s2614_s10 = smov 56  }
  0x56   : > { %235 = dma.hbm_to_vmem [thread:$0]  (%p2733_p7), %s2746_s9, %s2740_s23, %s3600_s2, %s2730_s14, %s2613_s17, %s2613_s17, %s2614_s10  }
  0x57 PF: > { %241 = sbr.rel (%p2709_p13) target bundleno = 1033 (0x409), region = 40  ;;  %s2773_s3 = sand.u32 (!%p2709_p13), 1, %s2598_s19  }
  0x58   : > { %s2344_s15 = smul.u32 (!%p2709_p13), 1792, %s2773_s3  ;;  %s244_s11 = scalar_lea.sflag (!%p2709_p13), [#allocation3], %s2773_s3 }
  0x5a   : > { %s2777_s16 = scalar_lea.vmem (!%p2709_p13), [#allocation2], %s2344_s15 }
  0x5c   : > { %2581 = dma.done.wait (%p2694_p6), %s244_s11, 28672  }
  0x5d   : > { %2583 = vsyncadd (%p2694_p6), %s244_s11, 4294938624  ;;  %p3601_p4 = scmp.eq.s32.totalorder %s2670_s22, 0 }
  0x5f   : > { %2585 = dma.done.wait (%p3601_p4), [#allocation6], 144   ;;  %p3602_p12 = pmov %p3601_p4 }
  0x60   : > { %v2272_v0 = vld [vmem:[%s3579_s1 + $0x38] sm:$0xff]  ;;  %v2271_v3 = vld [vmem:[%s3579_s1 + $0x30] sm:$0xff]  ;;  %v2270_v6 = vld [vmem:[%s3579_s1 + $0x28] sm:$0xff]  ;;  %vm1029_vm0 = vcmask 130048   ;;  %vm1768_vm1 = vcmask 523264   ;;  %vm1848_vm2 = vcmask 1041408  }
  0x61   : > { %2587 = vsyncadd (%p3602_p12), [#allocation6], 4294967152  ;;  %v2793_v1 = vld [vmem:[%s3579_s1 + $0x78] sm:$0xff]  ;;  %1078 = vmatpush.bf16.msra.mxu0 %v2272_v0  ;;  %2318 = vmatpush.bf16.msra.mxu3 %v2272_v0  ;;  %v2808_v4 = vld [vmem:[%s3579_s1 + $0x70] sm:$0xff]  ;;  %s2036_s26 = sshll.u32 %s2773_s3, 5  ;;  %s1906_s13 = scalar_lea.sflag [#allocation4], %s2773_s3 }
  0x62   : > { %v2798_v2 = vld [vmem:[%s3579_s1 + $0xb8] sm:$0xff]  ;;  %1167 = vmatpush.bf16.msra.mxu1 %v2793_v1  ;;  %v2813_v5 = vld [vmem:[%s3579_s1 + $0xb0] sm:$0xff]  ;;  %v2278_v7 = vld [vmem:[%s3579_s1 + $0x68] sm:$0xff]  ;;  %s3504_s29 = scalar_lea.vmem [#allocation8], %s2036_s26  ;;  %s2256_s12 = sshll.u32 (%p2701_p11), %s2670_s22, 1 }
  0x63   : > { %1256 = vmatpush.bf16.msra.mxu2 %v2798_v2  ;;  %v2826_v8 = vld [vmem:[%s3579_s1 + $0xa8] sm:$0xff]  ;;  %v2269_v9 = vld [vmem:[%s3579_s1 + $0x20] sm:$0xff]  ;;  %v2268_v12 = vld [vmem:[%s3579_s1 + $0x18] sm:$0xff]  ;;  %s1914_s25 = ssub.s32 (%p2701_p11), 3, %s2256_s12 }
  0x64   : > { %v2277_v10 = vld [vmem:[%s3579_s1 + $0x60] sm:$0xff]  ;;  %v2276_v13 = vld [vmem:[%s3579_s1 + $0x58] sm:$0xff]  ;;  %v2267_v15 = vld [vmem:[%s3579_s1 + $0x10] sm:$0xff]  ;;  %p1915_p6 = scmp.lt.s32.totalorder (%p2701_p11), %s1914_s25, 2 }
  0x65   : > { %1079 = vmatpush.bf16.msra.mxu0 %v2271_v3  ;;  %2319 = vmatpush.bf16.msra.mxu3 %v2271_v3  ;;  %v2838_v11 = vld [vmem:[%s3579_s1 + $0xa0] sm:$0xff]  ;;  %v2850_v14 = vld [vmem:[%s3579_s1 + $0x98] sm:$0xff]  ;;  %v2275_v16 = vld [vmem:[%s3579_s1 + $0x50] sm:$0xff] }
  0x66   : > { %1168 = vmatpush.bf16.msra.mxu1 %v2808_v4  ;;  %v2862_v17 = vld [vmem:[%s3579_s1 + $0x90] sm:$0xff]  ;;  %v2266_v18 = vld [vmem:[%s3579_s1 + $0x8] sm:$0xff]  ;;  %v2265_v21 = vld [vmem:[%s3579_s1] sm:$0xff] }
  0x67   : > { %1257 = vmatpush.bf16.msra.mxu2 %v2813_v5  ;;  %v2274_v19 = vld [vmem:[%s3579_s1 + $0x48] sm:$0xff]  ;;  %v2273_v22 = vld [vmem:[%s3579_s1 + $0x40] sm:$0xff]  ;;  %v304_v25 = vld [vmem:[%s2777_s16 + $0x38] sm:$0xff] }
  0x68   : > { %v2874_v20 = vld [vmem:[%s3579_s1 + $0x88] sm:$0xff]  ;;  %v2885_v23 = vld [vmem:[%s3579_s1 + $0x80] sm:$0xff]  ;;  %v500_v27 = vld [vmem:[%s2777_s16 + $0x658] sm:$0xff] }
  0x69   : > { %1080 = vmatpush.bf16.msra.mxu0 %v2270_v6  ;;  %2320 = vmatpush.bf16.msra.mxu3 %v2270_v6  ;;  %v297_v24 = vld [vmem:[%s2777_s16] sm:$0xff]  ;;  %v298_v28 = vld [vmem:[%s2777_s16 + $0x8] sm:$0xff]  ;;  %v299_v30 = vld [vmem:[%s2777_s16 + $0x10] sm:$0xff] }
  0x6a   : > { %1169 = vmatpush.bf16.msra.mxu1 %v2278_v7  ;;  %v493_v26 = vld [vmem:[%s2777_s16 + $0x620] sm:$0xff]  ;;  %v306_v31 = vld [vmem:[%s2777_s16 + $0x48] sm:$0xff]  ;;  %v521_v32 = vpack.c.bf16 %v304_v25, %v297_v24  ;;  %v311_v36 = vld [vmem:[%s2777_s16 + $0x70] sm:$0xff] }
  0x6b   : > { %1258 = vmatpush.bf16.msra.mxu2 %v2826_v8  ;;  %v305_v29 = vld [vmem:[%s2777_s16 + $0x40] sm:$0xff]  ;;  %v619_v33 = vpack.c.bf16 %v500_v27, %v493_v26  ;;  %v523_v35 = vpack.c.bf16 %v306_v31, %v299_v30  ;;  %v318_v37 = vld [vmem:[%s2777_s16 + $0xa8] sm:$0xff]  ;;  %v507_v38 = vld [vmem:[%s2777_s16 + $0x690] sm:$0xff] }
  0x6c   : > { %v522_v34 = vpack.c.bf16 %v305_v29, %v298_v28  ;;  %v514_v39 = vld [vmem:[%s2777_s16 + $0x6c8] sm:$0xff]  ;;  %v312_v40 = vld [vmem:[%s2777_s16 + $0x78] sm:$0xff]  ;;  %v319_v41 = vld [vmem:[%s2777_s16 + $0xb0] sm:$0xff]  ;;  %v528_v44 = vpack.c.bf16 %v318_v37, %v311_v36 }
  0x6d   : > { %1081 = vmatpush.bf16.msra.mxu0 %v2269_v9  ;;  %2321 = vmatpush.bf16.msra.mxu3 %v2269_v9  ;;  %v313_v42 = vld [vmem:[%s2777_s16 + $0x80] sm:$0xff]  ;;  %v320_v43 = vld [vmem:[%s2777_s16 + $0xb8] sm:$0xff]  ;;  %v626_v45 = vpack.c.bf16 %v514_v39, %v507_v38  ;;  %v529_v46 = vpack.c.bf16 %v319_v41, %v312_v40  ;;  %v326_v50 = vld [vmem:[%s2777_s16 + $0xe8] sm:$0xff] }
  0x6e   : > { %1170 = vmatpush.bf16.msra.mxu1 %v2277_v10  ;;  %v530_v47 = vpack.c.bf16 %v320_v43, %v313_v42  ;;  %v325_v48 = vld [vmem:[%s2777_s16 + $0xe0] sm:$0xff]  ;;  %v332_v49 = vld [vmem:[%s2777_s16 + $0x118] sm:$0xff]  ;;  %v494_v51 = vld [vmem:[%s2777_s16 + $0x628] sm:$0xff] }
  0x6f   : > { %1259 = vmatpush.bf16.msra.mxu2 %v2838_v11  ;;  %v501_v52 = vld [vmem:[%s2777_s16 + $0x660] sm:$0xff]  ;;  %v327_v54 = vld [vmem:[%s2777_s16 + $0xf0] sm:$0xff]  ;;  %v334_v55 = vld [vmem:[%s2777_s16 + $0x128] sm:$0xff]  ;;  %v535_v56 = vpack.c.bf16 %v332_v49, %v325_v48 }
  0x70   : > { %v333_v53 = vld [vmem:[%s2777_s16 + $0x120] sm:$0xff]  ;;  %v620_v57 = vpack.c.bf16 %v501_v52, %v494_v51  ;;  %v537_v59 = vpack.c.bf16 %v334_v55, %v327_v54  ;;  %v339_v60 = vld [vmem:[%s2777_s16 + $0x150] sm:$0xff]  ;;  %v346_v61 = vld [vmem:[%s2777_s16 + $0x188] sm:$0xff] }
  0x71   : > { %1082 = vmatpush.bf16.msra.mxu0 %v2268_v12  ;;  %2322 = vmatpush.bf16.msra.mxu3 %v2268_v12  ;;  %v536_v58 = vpack.c.bf16 %v333_v53, %v326_v50  ;;  %v340_v62 = vld [vmem:[%s2777_s16 + $0x158] sm:$0xff]  ;;  %v515_v0 = vld [vmem:[%s2777_s16 + $0x6d0] sm:$0xff]  ;;  %v353_v12 = vld [vmem:[%s2777_s16 + $0x1c0] sm:$0xff] }
  0x72   : > { %1171 = vmatpush.bf16.msra.mxu1 %v2276_v13  ;;  %v508_v63 = vld [vmem:[%s2777_s16 + $0x698] sm:$0xff]  ;;  %v2303_v26 = vld [vmem:[%s3579_s1 + $0x130] sm:$0xff]  ;;  %v2293_v27 = vld [vmem:[%s3579_s1 + $0xe0] sm:$0xff] }
  0x73   : > { %1260 = vmatpush.bf16.msra.mxu2 %v2850_v14  ;;  %v348_v3 = vld [vmem:[%s2777_s16 + $0x198] sm:$0xff]  ;;  %v627_v6 = vpack.c.bf16 %v515_v0, %v508_v63  ;;  %v367_v29 = vld [vmem:[%s2777_s16 + $0x230] sm:$0xff]  ;;  %v374_v30 = vld [vmem:[%s2777_s16 + $0x268] sm:$0xff] }
  0x74   : > { %v2292_v28 = vld [vmem:[%s3579_s1 + $0xd8] sm:$0xff]  ;;  %v2291_v37 = vld [vmem:[%s3579_s1 + $0xd0] sm:$0xff]  ;;  %v556_v38 = vpack.c.bf16 %v374_v30, %v367_v29  ;;  %v2290_v42 = vld [vmem:[%s3579_s1 + $0xc8] sm:$0xff] }
  0x75   : > { %1083 = vmatpush.bf16.msra.mxu0 %v2267_v15  ;;  %2323 = vmatpush.bf16.msra.mxu3 %v2267_v15  ;;  %v495_v15 = vld [vmem:[%s2777_s16 + $0x630] sm:$0xff]  ;;  %v368_v31 = vld [vmem:[%s2777_s16 + $0x238] sm:$0xff]  ;;  %v389_v50 = vld [vmem:[%s2777_s16 + $0x2e0] sm:$0xff] }
  0x76   : > { %1172 = vmatpush.bf16.msra.mxu1 %v2275_v16  ;;  %v376_v36 = vld [vmem:[%s2777_s16 + $0x278] sm:$0xff]  ;;  %v2311_v43 = vld [vmem:[%s3579_s1 + $0x170] sm:$0xff]  ;;  %v390_v52 = vld [vmem:[%s2777_s16 + $0x2e8] sm:$0xff] }
  0x77   : > { %1261 = vmatpush.bf16.msra.mxu2 %v2862_v17  ;;  %v300_v48 = vld [vmem:[%s2777_s16 + $0x18] sm:$0xff]  ;;  %v307_v49 = vld [vmem:[%s2777_s16 + $0x50] sm:$0xff]  ;;  %v397_v63 = vld [vmem:[%s2777_s16 + $0x320] sm:$0xff] }
  0x78   : > { %v383_v51 = vld [vmem:[%s2777_s16 + $0x2b0] sm:$0xff]  ;;  %v524_v54 = vpack.c.bf16 %v307_v49, %v300_v48  ;;  %v404_v0 = vld [vmem:[%s2777_s16 + $0x358] sm:$0xff] }
  0x79   : > { %1084 = vmatpush.bf16.msra.mxu0 %v2266_v18  ;;  %2324 = vmatpush.bf16.msra.mxu3 %v2266_v18  ;;  %v355_v18 = vld [vmem:[%s2777_s16 + $0x1d0] sm:$0xff] }
  0x7a   : > { %1173 = vmatpush.bf16.msra.mxu1 %v2274_v19  ;;  %v423_v30 = vld [vmem:[%s2777_s16 + $0x3f0] sm:$0xff] }
  0x7b   : > { %1262 = vmatpush.bf16.msra.mxu2 %v2874_v20 }
  0x7d   : > { %1085 = vmatpush.bf16.msra.mxu0 %v2265_v21  ;;  %2325 = vmatpush.bf16.msra.mxu3 %v2265_v21  ;;  %v2295_v21 = vld [vmem:[%s3579_s1 + $0xf0] sm:$0xff] }
  0x7e   : > { %1174 = vmatpush.bf16.msra.mxu1 %v2273_v22 }
  0x7f   : > { %1263 = vmatpush.bf16.msra.mxu2 %v2885_v23 }
  0x80   : > { %1086 = vmatmul.bf16.vlgmr.msra.gmra.mxu0 %v521_v32  ;;  %1156 = vmatmul.bf16.vlgmr.msra.gmra.mxu3 %v619_v33  ;;  %v509_v32 = vld [vmem:[%s2777_s16 + $0x6a0] sm:$0xff]  ;;  %v516_v33 = vld [vmem:[%s2777_s16 + $0x6d8] sm:$0xff] }
  0x81   : > { %2326 = vmatpush.bf16.msrb.mxu3 %v2793_v1  ;;  %1175 = vmatmul.bf16.vlgmr.msra.gmra.mxu1 %v522_v34  ;;  %v347_v1 = vld [vmem:[%s2777_s16 + $0x190] sm:$0xff]  ;;  %v628_v39 = vpack.c.bf16 %v516_v33, %v509_v32  ;;  %v430_v32 = vld [vmem:[%s2777_s16 + $0x428] sm:$0xff]  ;;  %v2301_v33 = vld [vmem:[%s3579_s1 + $0x120] sm:$0xff] }
  0x82   : > { %1264 = vmatmul.bf16.vlgmr.msra.gmra.mxu2 %v523_v35  ;;  %v375_v34 = vld [vmem:[%s2777_s16 + $0x270] sm:$0xff]  ;;  %v369_v35 = vld [vmem:[%s2777_s16 + $0x240] sm:$0xff] }
  0x83   : > { %v557_v40 = vpack.c.bf16 %v375_v34, %v368_v31  ;;  %v558_v41 = vpack.c.bf16 %v376_v36, %v369_v35  ;;  %v2309_v34 = vld [vmem:[%s3579_s1 + $0x160] sm:$0xff]  ;;  %v424_v35 = vld [vmem:[%s2777_s16 + $0x3f8] sm:$0xff]  ;;  %v342_v36 = vld [vmem:[%s2777_s16 + $0x168] sm:$0xff] }
  0x85   : > { %2327 = vmatpush.bf16.msrb.mxu3 %v2808_v4  ;;  %v542_v4 = vpack.c.bf16 %v346_v61, %v339_v60  ;;  %v314_v60 = vld [vmem:[%s2777_s16 + $0x88] sm:$0xff]  ;;  %v321_v61 = vld [vmem:[%s2777_s16 + $0xc0] sm:$0xff] }
  0x89   : > { %2328 = vmatpush.bf16.msrb.mxu3 %v2278_v7  ;;  %v543_v7 = vpack.c.bf16 %v347_v1, %v340_v62  ;;  %v403_v62 = vld [vmem:[%s2777_s16 + $0x350] sm:$0xff] }
  0x8d   : > { %2329 = vmatpush.bf16.msrb.mxu3 %v2277_v10  ;;  %v2312_v10 = vld [vmem:[%s3579_s1 + $0x178] sm:$0xff] }
  0x8e   : > { %1523 = vmatpush.bf16.msrb.mxu1 %v2312_v10  ;;  %v410_v10 = vld [vmem:[%s2777_s16 + $0x388] sm:$0xff] }
  0x90   : > { %1091 = vmatmul.bf16.gmra.mxu0 %v528_v44  ;;  %1161 = vmatmul.bf16.gmra.mxu3 %v626_v45  ;;  %v2289_v44 = vld [vmem:[%s3579_s1 + $0xc0] sm:$0xff] }
  0x91   : > { %2330 = vmatpush.bf16.msrb.mxu3 %v2276_v13  ;;  %1180 = vmatmul.bf16.gmra.mxu1 %v529_v46  ;;  %v360_v13 = vld [vmem:[%s2777_s16 + $0x1f8] sm:$0xff]  ;;  %v381_v45 = vld [vmem:[%s2777_s16 + $0x2a0] sm:$0xff] }
  0x92   : > { %1269 = vmatmul.bf16.gmra.mxu2 %v530_v47  ;;  %1524 = vmatpush.bf16.msrb.mxu1 %v2311_v43  ;;  %v388_v46 = vld [vmem:[%s2777_s16 + $0x2d8] sm:$0xff]  ;;  %v382_v47 = vld [vmem:[%s2777_s16 + $0x2a8] sm:$0xff]  ;;  %v584_v43 = vpack.c.bf16 %v430_v32, %v423_v30  ;;  %v377_v32 = vld [vmem:[%s2777_s16 + $0x280] sm:$0xff] }
  0x93   : > { %v563_v53 = vpack.c.bf16 %v388_v46, %v381_v45  ;;  %v564_v55 = vpack.c.bf16 %v389_v50, %v382_v47  ;;  %v452_v30 = vld [vmem:[%s2777_s16 + $0x4d8] sm:$0xff] }
  0x95   : > { %2331 = vmatpush.bf16.msrb.mxu3 %v2275_v16  ;;  %v502_v16 = vld [vmem:[%s2777_s16 + $0x668] sm:$0xff] }
  0x99   : > { %2332 = vmatpush.bf16.msrb.mxu3 %v2274_v19  ;;  %v362_v19 = vld [vmem:[%s2777_s16 + $0x208] sm:$0xff] }
  0x9a   : > { %v551_v25 = vpack.c.bf16 %v362_v19, %v355_v18 }
  0x9d   : > { %2333 = vmatpush.bf16.msrb.mxu3 %v2273_v22  ;;  %v621_v22 = vpack.c.bf16 %v502_v16, %v495_v15  ;;  %v418_v15 = vld [vmem:[%s2777_s16 + $0x3c8] sm:$0xff] }
  0xa0   : > { %1096 = vmatmul.bf16.gmra.mxu0 %v535_v56  ;;  %1245 = vmatmul.bf16.vlgmr.msrb.gmra.mxu3 %v620_v57  ;;  %v565_v56 = vpack.c.bf16 %v390_v52, %v383_v51  ;;  %v395_v57 = vld [vmem:[%s2777_s16 + $0x310] sm:$0xff] }
  0xa1   : > { %2334 = vmatpush.bf16.msra.mxu3 %v2798_v2  ;;  %1185 = vmatmul.bf16.gmra.mxu1 %v536_v58  ;;  %v341_v2 = vld [vmem:[%s2777_s16 + $0x160] sm:$0xff]  ;;  %v402_v58 = vld [vmem:[%s2777_s16 + $0x348] sm:$0xff] }
  0xa2   : > { %1274 = vmatmul.bf16.gmra.mxu2 %v537_v59  ;;  %v544_v9 = vpack.c.bf16 %v348_v3, %v341_v2  ;;  %v396_v59 = vld [vmem:[%s2777_s16 + $0x318] sm:$0xff]  ;;  %v570_v1 = vpack.c.bf16 %v402_v58, %v395_v57  ;;  %v531_v2 = vpack.c.bf16 %v321_v61, %v314_v60  ;;  %v438_v61 = vld [vmem:[%s2777_s16 + $0x468] sm:$0xff] }
  0xa3   : > { %v571_v3 = vpack.c.bf16 %v403_v62, %v396_v59  ;;  %v437_v59 = vld [vmem:[%s2777_s16 + $0x460] sm:$0xff]  ;;  %v444_v60 = vld [vmem:[%s2777_s16 + $0x498] sm:$0xff] }
  0xa4   : > { %v356_v62 = vld [vmem:[%s2777_s16 + $0x1d8] sm:$0xff] }
  0xa5   : > { %2335 = vmatpush.bf16.msra.mxu3 %v2813_v5  ;;  %v2313_v5 = vld [vmem:[%s3579_s1 + $0x180] sm:$0xff] }
  0xa6   : > { %1619 = vmatpush.bf16.msrb.mxu2 %v2313_v5  ;;  %v409_v5 = vld [vmem:[%s2777_s16 + $0x380] sm:$0xff] }
  0xa9   : > { %2336 = vmatpush.bf16.msra.mxu3 %v2826_v8  ;;  %v2304_v8 = vld [vmem:[%s3579_s1 + $0x138] sm:$0xff] }
  0xaa   : > { %1434 = vmatpush.bf16.msrb.mxu0 %v2304_v8  ;;  %v416_v8 = vld [vmem:[%s2777_s16 + $0x3b8] sm:$0xff] }
  0xab   : > { %v577_v16 = vpack.c.bf16 %v416_v8, %v409_v5 }
  0xad   : > { %2337 = vmatpush.bf16.msra.mxu3 %v2838_v11  ;;  %v2296_v11 = vld [vmem:[%s3579_s1 + $0xf8] sm:$0xff] }
  0xae   : > { %1435 = vmatpush.bf16.msrb.mxu0 %v2303_v26 }
  0xb0   : > { %1101 = vmatmul.bf16.gmra.mxu0 %v542_v4  ;;  %1250 = vmatmul.bf16.gmra.mxu3 %v627_v6  ;;  %v572_v4 = vpack.c.bf16 %v404_v0, %v397_v63  ;;  %v2302_v6 = vld [vmem:[%s3579_s1 + $0x128] sm:$0xff]  ;;  %v363_v63 = vld [vmem:[%s2777_s16 + $0x210] sm:$0xff]  ;;  %v445_v0 = vld [vmem:[%s2777_s16 + $0x4a0] sm:$0xff] }
  0xb1   : > { %2338 = vmatpush.bf16.msra.mxu3 %v2850_v14  ;;  %1190 = vmatmul.bf16.gmra.mxu1 %v543_v7  ;;  %v354_v14 = vld [vmem:[%s2777_s16 + $0x1c8] sm:$0xff] }
  0xb2   : > { %1279 = vmatmul.bf16.gmra.mxu2 %v544_v9  ;;  %1436 = vmatpush.bf16.msrb.mxu0 %v2302_v6  ;;  %v2310_v7 = vld [vmem:[%s3579_s1 + $0x168] sm:$0xff]  ;;  %v3008_v9 = vld [vmem:[#allocation5] ss:$0 sm:$0xff]  ;;  %v591_v6 = vpack.c.bf16 %v444_v60, %v437_v59 }
  0xb3   : > { %1525 = vmatpush.bf16.msrb.mxu1 %v2310_v7  ;;  %v552_v7 = vpack.c.bf16 %v363_v63, %v356_v62  ;;  %v465_v60 = vld [vmem:[%s2777_s16 + $0x540] sm:$0xff]  ;;  %v472_v63 = vld [vmem:[%s2777_s16 + $0x578] sm:$0xff] }
  0xb5   : > { %2339 = vmatpush.bf16.msra.mxu3 %v2862_v17  ;;  %v361_v17 = vld [vmem:[%s2777_s16 + $0x200] sm:$0xff] }
  0xb6   : > { %v550_v24 = vpack.c.bf16 %v361_v17, %v354_v14  ;;  %v411_v14 = vld [vmem:[%s2777_s16 + $0x390] sm:$0xff]  ;;  %1437 = vmatpush.bf16.msrb.mxu0 %v2301_v33 }
  0xb7   : > { %1526 = vmatpush.bf16.msrb.mxu1 %v2309_v34  ;;  %v459_v33 = vld [vmem:[%s2777_s16 + $0x510] sm:$0xff]  ;;  %v453_v34 = vld [vmem:[%s2777_s16 + $0x4e0] sm:$0xff] }
  0xb9   : > { %2340 = vmatpush.bf16.msra.mxu3 %v2874_v20  ;;  %v549_v20 = vpack.c.bf16 %v360_v13, %v353_v12  ;;  %v335_v12 = vld [vmem:[%s2777_s16 + $0x130] sm:$0xff]  ;;  %v417_v13 = vld [vmem:[%s2777_s16 + $0x3c0] sm:$0xff] }
  0xba   : > { %v578_v19 = vpack.c.bf16 %v417_v13, %v410_v10  ;;  %v592_v10 = vpack.c.bf16 %v445_v0, %v438_v61  ;;  %v2298_v0 = vld [vmem:[%s3579_s1 + $0x108] sm:$0xff] }
  0xbd   : > { %2341 = vmatpush.bf16.msra.mxu3 %v2885_v23  ;;  %v2294_v23 = vld [vmem:[%s3579_s1 + $0xe8] sm:$0xff] }
  0xc0   : > { %1106 = vmatmul.bf16.gmra.mxu0 %v549_v20  ;;  %1334 = vmatmul.bf16.vlgmr.msra.gmra.mxu3 %v621_v22 }
  0xc1   : > { %1345 = vmatpush.bf16.msrb.mxu3 %v2296_v11  ;;  %1195 = vmatmul.bf16.gmra.mxu1 %v550_v24  ;;  %v328_v11 = vld [vmem:[%s2777_s16 + $0xf8] sm:$0xff] }
  0xc2   : > { %1284 = vmatmul.bf16.gmra.mxu2 %v551_v25  ;;  %v538_v17 = vpack.c.bf16 %v335_v12, %v328_v11 }
  0xc5   : > { %1346 = vmatpush.bf16.msrb.mxu3 %v2295_v21  ;;  %v579_v21 = vpack.c.bf16 %v418_v15, %v411_v14 }
  0xc9   : > { %1347 = vmatpush.bf16.msrb.mxu3 %v2294_v23 }
  0xcd   : > { %1348 = vmatpush.bf16.msrb.mxu3 %v2293_v27 }
  0xd0   : > { %1111 = vmatmul.bf16.gmra.mxu0 %v556_v38  ;;  %1339 = vmatmul.bf16.gmra.mxu3 %v628_v39  ;;  %v431_v38 = vld [vmem:[%s2777_s16 + $0x430] sm:$0xff]  ;;  %v425_v39 = vld [vmem:[%s2777_s16 + $0x400] sm:$0xff] }
  0xd1   : > { %1349 = vmatpush.bf16.msrb.mxu3 %v2292_v28  ;;  %1200 = vmatmul.bf16.gmra.mxu1 %v557_v40  ;;  %v432_v40 = vld [vmem:[%s2777_s16 + $0x438] sm:$0xff]  ;;  %v585_v47 = vpack.c.bf16 %v431_v38, %v424_v35 }
  0xd2   : > { %1289 = vmatmul.bf16.gmra.mxu2 %v558_v41  ;;  %v586_v48 = vpack.c.bf16 %v432_v40, %v425_v39  ;;  %v460_v35 = vld [vmem:[%s2777_s16 + $0x518] sm:$0xff] }
  0xd5   : > { %1350 = vmatpush.bf16.msrb.mxu3 %v2291_v37  ;;  %v349_v37 = vld [vmem:[%s2777_s16 + $0x1a0] sm:$0xff] }
  0xd9   : > { %1351 = vmatpush.bf16.msrb.mxu3 %v2290_v42 }
  0xdd   : > { %1352 = vmatpush.bf16.msrb.mxu3 %v2289_v44  ;;  %v545_v44 = vpack.c.bf16 %v349_v37, %v342_v36 }
  0xe0   : > { %1116 = vmatmul.bf16.gmra.mxu0 %v563_v53  ;;  %1353 = vmatmul.bf16.vlgmr.msrb.gmra.mxu3 %v524_v54 }
  0xe1   : > { %1205 = vmatmul.bf16.gmra.mxu1 %v564_v55 }
  0xe2   : > { %1294 = vmatmul.bf16.gmra.mxu2 %v565_v56 }
  0xf0   : > { %1121 = vmatmul.bf16.gmra.mxu0 %v570_v1  ;;  %1358 = vmatmul.bf16.gmra.mxu3 %v531_v2  ;;  %v439_v1 = vld [vmem:[%s2777_s16 + $0x470] sm:$0xff]  ;;  %v446_v2 = vld [vmem:[%s2777_s16 + $0x4a8] sm:$0xff] }
  0xf1   : > { %1210 = vmatmul.bf16.gmra.mxu1 %v571_v3  ;;  %v593_v11 = vpack.c.bf16 %v446_v2, %v439_v1  ;;  %v2306_v1 = vld [vmem:[%s3579_s1 + $0x148] sm:$0xff] }
  0xf2   : > { %1299 = vmatmul.bf16.gmra.mxu2 %v572_v4  ;;  %v466_v2 = vld [vmem:[%s2777_s16 + $0x548] sm:$0xff] }
  0xfd   : > { %v1087_v18 = vpop.f32.mrf.mxu0 }
  0xfe   : > { %v1088_v20 = vadd.f32 %v3008_v9, %v1087_v18  ;;  %v1176_v22 = vpop.f32.mrf.mxu1 }
 0x100   : > { %v1177_v24 = vadd.f32 %v1176_v22, %v1088_v20  ;;  %1126 = vmatmul.bf16.gmra.mxu0 %v577_v16  ;;  %1363 = vmatmul.bf16.gmra.mxu3 %v538_v17  ;;  %v2300_v20 = vld [vmem:[%s3579_s1 + $0x118] sm:$0xff] }
 0x101   : > { %1215 = vmatmul.bf16.gmra.mxu1 %v578_v19  ;;  %1438 = vmatpush.bf16.msrb.mxu0 %v2300_v20 }
 0x102   : > { %1304 = vmatmul.bf16.gmra.mxu2 %v579_v21 }
 0x103   : > { %v1157_v25 = vpop.f32.mrf.mxu3 }
 0x104   : > { %v1158_v14 = vadd.f32 %v3008_v9, %v1157_v25 }
 0x105   : > { %v1265_v23 = vpop.f32.mrf.mxu2  ;;  %v1089_v27 = vpop.f32.mrf.mxu0 }
 0x106   : > { %v3019_v26 = vadd.f32 %v1265_v23, %v1177_v24  ;;  %v1090_v28 = vadd.f32 %v3008_v9, %v1089_v27  ;;  %v1178_v29 = vpop.f32.mrf.mxu1  ;;  %v451_v27 = vld [vmem:[%s2777_s16 + $0x4d0] sm:$0xff] }
 0x108   : > { %v1179_v31 = vadd.f32 %v1178_v29, %v1090_v28  ;;  %v458_v28 = vld [vmem:[%s2777_s16 + $0x508] sm:$0xff]  ;;  %v2308_v29 = vld [vmem:[%s3579_s1 + $0x158] sm:$0xff] }
 0x109   : > { %1527 = vmatpush.bf16.msrb.mxu1 %v2308_v29  ;;  %v598_v39 = vpack.c.bf16 %v458_v28, %v451_v27 }
 0x10b   : > { %v1159_v41 = vpop.f32.mrf.mxu3 }
 0x10c   : > { %v1160_v25 = vadd.f32 %v3008_v9, %v1159_v41 }
 0x10d   : > { %v1267_v42 = vpop.f32.mrf.mxu2  ;;  %v1092_v46 = vpop.f32.mrf.mxu0 }
 0x10e   : > { %v3036_v45 = vadd.f32 %v1267_v42, %v1179_v31  ;;  %v1093_v49 = vadd.f32 %v3008_v9, %v1092_v46  ;;  %v1181_v50 = vpop.f32.mrf.mxu1  ;;  %v370_v31 = vld [vmem:[%s2777_s16 + $0x248] sm:$0xff] }
 0x10f   : > { %v559_v40 = vpack.c.bf16 %v377_v32, %v370_v31 }
 0x110   : > { %v1182_v51 = vadd.f32 %v1181_v50, %v1093_v49  ;;  %1131 = vmatmul.bf16.gmra.mxu0 %v584_v43  ;;  %1368 = vmatmul.bf16.gmra.mxu3 %v545_v44  ;;  %v599_v43 = vpack.c.bf16 %v459_v33, %v452_v30  ;;  %v600_v44 = vpack.c.bf16 %v460_v35, %v453_v34  ;;  %v479_v35 = vld [vmem:[%s2777_s16 + $0x5b0] sm:$0xff] }
 0x111   : > { %1220 = vmatmul.bf16.gmra.mxu1 %v585_v47 }
 0x112   : > { %1309 = vmatmul.bf16.gmra.mxu2 %v586_v48 }
 0x113   : > { %v3039_v52 = vpop.f32.mrf.mxu3 }
 0x114   : > { %v1163_v48 = vadd.f32 %v3008_v9, %v3039_v52  ;;  %v2307_v52 = vld [vmem:[%s3579_s1 + $0x150] sm:$0xff] }
 0x115   : > { %v1270_v53 = vpop.f32.mrf.mxu2  ;;  %v1094_v55 = vpop.f32.mrf.mxu0  ;;  %1528 = vmatpush.bf16.msrb.mxu1 %v2307_v52 }
 0x116   : > { %v3041_v54 = vadd.f32 %v1270_v53, %v1182_v51  ;;  %v1095_v56 = vadd.f32 %v3008_v9, %v1094_v55  ;;  %v1183_v57 = vpop.f32.mrf.mxu1  ;;  %v2299_v55 = vld [vmem:[%s3579_s1 + $0x110] sm:$0xff] }
 0x117   : > { %1439 = vmatpush.bf16.msrb.mxu0 %v2299_v55 }
 0x118   : > { %v1184_v58 = vadd.f32 %v1183_v57, %v1095_v56 }
 0x119   : > { %1529 = vmatpush.bf16.msrb.mxu1 %v2306_v1 }
 0x11b   : > { %v3052_v3 = vpop.f32.mrf.mxu3  ;;  %1440 = vmatpush.bf16.msrb.mxu0 %v2298_v0 }
 0x11c   : > { %v1165_v61 = vadd.f32 %v3008_v9, %v3052_v3 }
 0x11d   : > { %v1272_v4 = vpop.f32.mrf.mxu2  ;;  %v1097_v8 = vpop.f32.mrf.mxu0 }
 0x11e   : > { %v3054_v5 = vadd.f32 %v1272_v4, %v1184_v58  ;;  %v1098_v12 = vadd.f32 %v3008_v9, %v1097_v8  ;;  %v1186_v13 = vpop.f32.mrf.mxu1  ;;  %v384_v4 = vld [vmem:[%s2777_s16 + $0x2b8] sm:$0xff]  ;;  %v467_v8 = vld [vmem:[%s2777_s16 + $0x550] sm:$0xff] }
 0x120   : > { %v1187_v15 = vadd.f32 %v1186_v13, %v1098_v12  ;;  %1136 = vmatmul.bf16.gmra.mxu0 %v591_v6  ;;  %1373 = vmatmul.bf16.gmra.mxu3 %v552_v7  ;;  %v391_v6 = vld [vmem:[%s2777_s16 + $0x2f0] sm:$0xff]  ;;  %v473_v7 = vld [vmem:[%s2777_s16 + $0x580] sm:$0xff]  ;;  %v605_v13 = vpack.c.bf16 %v472_v63, %v465_v60 }
 0x121   : > { %1225 = vmatmul.bf16.gmra.mxu1 %v592_v10  ;;  %v474_v10 = vld [vmem:[%s2777_s16 + $0x588] sm:$0xff]  ;;  %v606_v20 = vpack.c.bf16 %v473_v7, %v466_v2  ;;  %v301_v7 = vld [vmem:[%s2777_s16 + $0x20] sm:$0xff] }
 0x122   : > { %1314 = vmatmul.bf16.gmra.mxu2 %v593_v11 }
 0x123   : > { %v1246_v16 = vpop.f32.mrf.mxu3 }
 0x124   : > { %v3058_v17 = vadd.f32 %v1246_v16, %v1158_v14  ;;  %v566_v14 = vpack.c.bf16 %v391_v6, %v384_v4  ;;  %v2305_v16 = vld [vmem:[%s3579_s1 + $0x140] sm:$0xff]  ;;  %v412_v4 = vld [vmem:[%s2777_s16 + $0x398] sm:$0xff]  ;;  %v419_v6 = vld [vmem:[%s2777_s16 + $0x3d0] sm:$0xff] }
 0x125   : > { %v1275_v18 = vpop.f32.mrf.mxu2  ;;  %v1099_v21 = vpop.f32.mrf.mxu0  ;;  %1530 = vmatpush.bf16.msrb.mxu1 %v2305_v16  ;;  %v580_v16 = vpack.c.bf16 %v419_v6, %v412_v4 }
 0x126   : > { %v3060_v19 = vadd.f32 %v1275_v18, %v1187_v15  ;;  %v1100_v22 = vadd.f32 %v3008_v9, %v1099_v21  ;;  %v1188_v24 = vpop.f32.mrf.mxu1  ;;  %v2297_v15 = vld [vmem:[%s3579_s1 + $0x100] sm:$0xff] }
 0x127   : > { %1441 = vmatpush.bf16.msrb.mxu0 %v2297_v15 }
 0x128   : > { %v1189_v23 = vadd.f32 %v1188_v24, %v1100_v22  ;;  %v607_v22 = vpack.c.bf16 %v474_v10, %v467_v8  ;;  %v308_v8 = vld [vmem:[%s2777_s16 + $0x58] sm:$0xff]  ;;  %v302_v10 = vld [vmem:[%s2777_s16 + $0x28] sm:$0xff] }
 0x12b   : > { %v1248_v36 = vpop.f32.mrf.mxu3 }
 0x12c   : > { %v3078_v37 = vadd.f32 %v1248_v36, %v1160_v25  ;;  %v486_v36 = vld [vmem:[%s2777_s16 + $0x5e8] sm:$0xff] }
 0x12d   : > { %v1277_v38 = vpop.f32.mrf.mxu2  ;;  %v1102_v42 = vpop.f32.mrf.mxu0 }
 0x12e   : > { %v3080_v41 = vadd.f32 %v1277_v38, %v1189_v23  ;;  %v1103_v46 = vadd.f32 %v3008_v9, %v1102_v42  ;;  %v1191_v47 = vpop.f32.mrf.mxu1  ;;  %v480_v38 = vld [vmem:[%s2777_s16 + $0x5b8] sm:$0xff]  ;;  %v487_v42 = vld [vmem:[%s2777_s16 + $0x5f0] sm:$0xff] }
 0x12f   : > { %v613_v55 = vpack.c.bf16 %v487_v42, %v480_v38  ;;  %v315_v42 = vld [vmem:[%s2777_s16 + $0x90] sm:$0xff] }
 0x130   : > { %v1192_v49 = vadd.f32 %v1191_v47, %v1103_v46  ;;  %1141 = vmatmul.bf16.gmra.mxu0 %v598_v39  ;;  %1378 = vmatmul.bf16.gmra.mxu3 %v559_v40  ;;  %v398_v39 = vld [vmem:[%s2777_s16 + $0x328] sm:$0xff]  ;;  %v405_v40 = vld [vmem:[%s2777_s16 + $0x360] sm:$0xff] }
 0x131   : > { %1230 = vmatmul.bf16.gmra.mxu1 %v599_v43  ;;  %v481_v43 = vld [vmem:[%s2777_s16 + $0x5c0] sm:$0xff] }
 0x132   : > { %1319 = vmatmul.bf16.gmra.mxu2 %v600_v44  ;;  %v488_v44 = vld [vmem:[%s2777_s16 + $0x5f8] sm:$0xff] }
 0x133   : > { %v1251_v50 = vpop.f32.mrf.mxu3  ;;  %v614_v52 = vpack.c.bf16 %v488_v44, %v481_v43  ;;  %v322_v43 = vld [vmem:[%s2777_s16 + $0xc8] sm:$0xff]  ;;  %v316_v44 = vld [vmem:[%s2777_s16 + $0x98] sm:$0xff] }
 0x134   : > { %v3085_v51 = vadd.f32 %v1251_v50, %v1163_v48  ;;  %v612_v48 = vpack.c.bf16 %v486_v36, %v479_v35 }
 0x135   : > { %v1280_v53 = vpop.f32.mrf.mxu2  ;;  %v1104_v57 = vpop.f32.mrf.mxu0 }
 0x136   : > { %v3093_v56 = vadd.f32 %v1280_v53, %v1192_v49  ;;  %v1105_v58 = vadd.f32 %v3008_v9, %v1104_v57  ;;  %v1193_v59 = vpop.f32.mrf.mxu1  ;;  %v573_v49 = vpack.c.bf16 %v405_v40, %v398_v39  ;;  %v426_v39 = vld [vmem:[%s2777_s16 + $0x408] sm:$0xff]  ;;  %v433_v40 = vld [vmem:[%s2777_s16 + $0x440] sm:$0xff] }
 0x138   : > { %v1194_v62 = vadd.f32 %v1193_v59, %v1105_v58 }
 0x13b   : > { %v1253_v11 = vpop.f32.mrf.mxu3 }
 0x13c   : > { %v3112_v3 = vadd.f32 %v1253_v11, %v1165_v61  ;;  %v309_v11 = vld [vmem:[%s2777_s16 + $0x60] sm:$0xff] }
 0x13d   : > { %v1282_v12 = vpop.f32.mrf.mxu2  ;;  %v1107_v21 = vpop.f32.mrf.mxu0 }
 0x13e   : > { %v3120_v18 = vadd.f32 %v1282_v12, %v1194_v62  ;;  %v1108_v24 = vadd.f32 %v3008_v9, %v1107_v21  ;;  %v1196_v25 = vpop.f32.mrf.mxu1  ;;  %v303_v12 = vld [vmem:[%s2777_s16 + $0x30] sm:$0xff]  ;;  %v525_v21 = vpack.c.bf16 %v308_v8, %v301_v7 }
 0x140   : > { %v1197_v23 = vadd.f32 %v1196_v25, %v1108_v24  ;;  %1146 = vmatmul.bf16.gmra.mxu0 %v605_v13  ;;  %1383 = vmatmul.bf16.gmra.mxu3 %v566_v14  ;;  %v310_v13 = vld [vmem:[%s2777_s16 + $0x68] sm:$0xff]  ;;  %v526_v24 = vpack.c.bf16 %v309_v11, %v302_v10  ;;  %v440_v11 = vld [vmem:[%s2777_s16 + $0x478] sm:$0xff] }
 0x141   : > { %1235 = vmatmul.bf16.gmra.mxu1 %v606_v20  ;;  %v527_v25 = vpack.c.bf16 %v310_v13, %v303_v12  ;;  %v447_v12 = vld [vmem:[%s2777_s16 + $0x4b0] sm:$0xff]  ;;  %v329_v13 = vld [vmem:[%s2777_s16 + $0x100] sm:$0xff] }
 0x142   : > { %1324 = vmatmul.bf16.gmra.mxu2 %v607_v22 }
 0x143   : > { %v1335_v27 = vpop.f32.mrf.mxu3 }
 0x144   : > { %v3124_v29 = vadd.f32 %v1335_v27, %v3058_v17 }
 0x145   : > { %v1285_v28 = vpop.f32.mrf.mxu2  ;;  %v1109_v31 = vpop.f32.mrf.mxu0 }
 0x146   : > { %v3126_v30 = vadd.f32 %v1285_v28, %v1197_v23  ;;  %v1110_v32 = vadd.f32 %v3008_v9, %v1109_v31  ;;  %v1198_v33 = vpop.f32.mrf.mxu1 }
 0x148   : > { %v1199_v34 = vadd.f32 %v1198_v33, %v1110_v32 }
 0x14b   : > { %v1337_v46 = vpop.f32.mrf.mxu3 }
 0x14c   : > { %v3138_v17 = vadd.f32 %v1337_v46, %v3078_v37  ;;  %v323_v46 = vld [vmem:[%s2777_s16 + $0xd0] sm:$0xff] }
 0x14d   : > { %v1287_v47 = vpop.f32.mrf.mxu2  ;;  %v1112_v53 = vpop.f32.mrf.mxu0 }
 0x14e   : > { %v3140_v50 = vadd.f32 %v1287_v47, %v1199_v34  ;;  %v1113_v57 = vadd.f32 %v3008_v9, %v1112_v53  ;;  %v1201_v58 = vpop.f32.mrf.mxu1  ;;  %v317_v47 = vld [vmem:[%s2777_s16 + $0xa0] sm:$0xff] }
 0x150   : > { %v1202_v59 = vadd.f32 %v1201_v58, %v1113_v57  ;;  %1151 = vmatmul.bf16.gmra.mxu0 %v612_v48  ;;  %1388 = vmatmul.bf16.gmra.mxu3 %v573_v49  ;;  %v324_v48 = vld [vmem:[%s2777_s16 + $0xd8] sm:$0xff] }
 0x151   : > { %1240 = vmatmul.bf16.gmra.mxu1 %v613_v55  ;;  %v587_v55 = vpack.c.bf16 %v433_v40, %v426_v39 }
 0x152   : > { %1329 = vmatmul.bf16.gmra.mxu2 %v614_v52  ;;  %v532_v52 = vpack.c.bf16 %v322_v43, %v315_v42 }
 0x153   : > { %v1340_v37 = vpop.f32.mrf.mxu3 }
 0x154   : > { %v3144_v61 = vadd.f32 %v1340_v37, %v3085_v51  ;;  %v534_v37 = vpack.c.bf16 %v324_v48, %v317_v47  ;;  %v454_v48 = vld [vmem:[%s2777_s16 + $0x4e8] sm:$0xff] }
 0x155   : > { %v1290_v60 = vpop.f32.mrf.mxu2  ;;  %v1114_v63 = vpop.f32.mrf.mxu0 }
 0x156   : > { %v3146_v62 = vadd.f32 %v1290_v60, %v1202_v59  ;;  %v1115_v0 = vadd.f32 %v3008_v9, %v1114_v63  ;;  %v1203_v1 = vpop.f32.mrf.mxu1  ;;  %v533_v59 = vpack.c.bf16 %v323_v46, %v316_v44 }
 0x158   : > { %v1204_v2 = vadd.f32 %v1203_v1, %v1115_v0 }
 0x15b   : > { %v1342_v14 = vpop.f32.mrf.mxu3 }
 0x15c   : > { %v3158_v51 = vadd.f32 %v1342_v14, %v3112_v3  ;;  %v336_v14 = vld [vmem:[%s2777_s16 + $0x138] sm:$0xff] }
 0x15d   : > { %v1292_v15 = vpop.f32.mrf.mxu2  ;;  %v1117_v22 = vpop.f32.mrf.mxu0 }
 0x15e   : > { %v3160_v20 = vadd.f32 %v1292_v15, %v1204_v2  ;;  %v1118_v23 = vadd.f32 %v3008_v9, %v1117_v22  ;;  %v1206_v27 = vpop.f32.mrf.mxu1  ;;  %v330_v15 = vld [vmem:[%s2777_s16 + $0x108] sm:$0xff] }
 0x15f   : > { %v338_v22 = vld [vmem:[%s2777_s16 + $0x148] sm:$0xff] }
 0x160   : > { %v1207_v28 = vadd.f32 %v1206_v27, %v1118_v23  ;;  %1393 = vmatmul.bf16.gmra.mxu3 %v580_v16  ;;  %1442 = vmatmul.bf16.vlgmr.msrb.gmra.mxu0 %v525_v21  ;;  %v337_v16 = vld [vmem:[%s2777_s16 + $0x140] sm:$0xff]  ;;  %v331_v21 = vld [vmem:[%s2777_s16 + $0x110] sm:$0xff]  ;;  %v594_v23 = vpack.c.bf16 %v447_v12, %v440_v11  ;;  %v539_v27 = vpack.c.bf16 %v336_v14, %v329_v13 }
 0x161   : > { %1531 = vmatmul.bf16.vlgmr.msrb.gmra.mxu1 %v526_v24 }
 0x162   : > { %2233 = vmatmul.msk.bf16.vlgmr.msrb.gmra.mxu2 %vm1029_vm0, %v527_v25 }
 0x163   : > { %v1354_v3 = vpop.f32.mrf.mxu3 }
 0x164   : > { %v3165_v32 = vadd.f32 %v1354_v3, %v3019_v26 }
 0x165   : > { %v1295_v31 = vpop.f32.mrf.mxu2  ;;  %v1119_v34 = vpop.f32.mrf.mxu0 }
 0x166   : > { %v3167_v33 = vadd.f32 %v1295_v31, %v1207_v28  ;;  %v1120_v35 = vadd.f32 %v3008_v9, %v1119_v34  ;;  %v1208_v36 = vpop.f32.mrf.mxu1  ;;  %v540_v31 = vpack.c.bf16 %v337_v16, %v330_v15  ;;  %v541_v34 = vpack.c.bf16 %v338_v22, %v331_v21 }
 0x168   : > { %v1209_v38 = vadd.f32 %v1208_v36, %v1120_v35 }
 0x16b   : > { %v1356_v49 = vpop.f32.mrf.mxu3 }
 0x16c   : > { %v3179_v26 = vadd.f32 %v1356_v49, %v3036_v45  ;;  %v461_v49 = vld [vmem:[%s2777_s16 + $0x520] sm:$0xff] }
 0x16d   : > { %v1297_v53 = vpop.f32.mrf.mxu2  ;;  %v1122_v58 = vpop.f32.mrf.mxu0 }
 0x16e   : > { %v3181_v57 = vadd.f32 %v1297_v53, %v1209_v38  ;;  %v1123_v60 = vadd.f32 %v3008_v9, %v1122_v58  ;;  %v1211_v63 = vpop.f32.mrf.mxu1  ;;  %v343_v53 = vld [vmem:[%s2777_s16 + $0x170] sm:$0xff] }
 0x16f   : > { %v351_v58 = vld [vmem:[%s2777_s16 + $0x1b0] sm:$0xff] }
 0x170   : > { %v1212_v0 = vadd.f32 %v1211_v63, %v1123_v60  ;;  %1398 = vmatmul.bf16.gmra.mxu3 %v587_v55  ;;  %1447 = vmatmul.bf16.gmra.mxu0 %v532_v52  ;;  %v350_v55 = vld [vmem:[%s2777_s16 + $0x1a8] sm:$0xff]  ;;  %v344_v52 = vld [vmem:[%s2777_s16 + $0x178] sm:$0xff] }
 0x171   : > { %1536 = vmatmul.bf16.gmra.mxu1 %v533_v59  ;;  %v345_v59 = vld [vmem:[%s2777_s16 + $0x180] sm:$0xff] }
 0x172   : > { %2234 = vmatmul.msk.bf16.gmra.mxu2 %vm1029_vm0, %v534_v37  ;;  %v352_v37 = vld [vmem:[%s2777_s16 + $0x1b8] sm:$0xff] }
 0x173   : > { %v1359_v45 = vpop.f32.mrf.mxu3 }
 0x174   : > { %v3186_v2 = vadd.f32 %v1359_v45, %v3041_v54  ;;  %v546_v45 = vpack.c.bf16 %v350_v55, %v343_v53 }
 0x175   : > { %v1300_v1 = vpop.f32.mrf.mxu2  ;;  %v1124_v6 = vpop.f32.mrf.mxu0 }
 0x176   : > { %v3188_v4 = vadd.f32 %v1300_v1, %v1212_v0  ;;  %v1125_v7 = vadd.f32 %v3008_v9, %v1124_v6  ;;  %v1213_v8 = vpop.f32.mrf.mxu1  ;;  %v601_v0 = vpack.c.bf16 %v461_v49, %v454_v48 }
 0x178   : > { %v1214_v10 = vadd.f32 %v1213_v8, %v1125_v7  ;;  %v547_v7 = vpack.c.bf16 %v351_v58, %v344_v52  ;;  %v548_v8 = vpack.c.bf16 %v352_v37, %v345_v59 }
 0x17b   : > { %v1361_v24 = vpop.f32.mrf.mxu3 }
 0x17c   : > { %v3200_v54 = vadd.f32 %v1361_v24, %v3054_v5 }
 0x17d   : > { %v1302_v25 = vpop.f32.mrf.mxu2  ;;  %v1127_v3 = vpop.f32.mrf.mxu0 }
 0x17e   : > { %v3202_v28 = vadd.f32 %v1302_v25, %v1214_v10  ;;  %v1128_v35 = vadd.f32 %v3008_v9, %v1127_v3  ;;  %v1216_v36 = vpop.f32.mrf.mxu1  ;;  %v468_v25 = vld [vmem:[%s2777_s16 + $0x558] sm:$0xff] }
 0x17f   : > { %v364_v3 = vld [vmem:[%s2777_s16 + $0x218] sm:$0xff] }
 0x180   : > { %v1217_v38 = vadd.f32 %v1216_v36, %v1128_v35  ;;  %1403 = vmatmul.bf16.gmra.mxu3 %v594_v23  ;;  %1452 = vmatmul.bf16.gmra.mxu0 %v539_v27  ;;  %v475_v23 = vld [vmem:[%s2777_s16 + $0x590] sm:$0xff]  ;;  %v357_v27 = vld [vmem:[%s2777_s16 + $0x1e0] sm:$0xff]  ;;  %v366_v36 = vld [vmem:[%s2777_s16 + $0x228] sm:$0xff] }
 0x181   : > { %1541 = vmatmul.bf16.gmra.mxu1 %v540_v31  ;;  %v358_v31 = vld [vmem:[%s2777_s16 + $0x1e8] sm:$0xff]  ;;  %v359_v35 = vld [vmem:[%s2777_s16 + $0x1f0] sm:$0xff] }
 0x182   : > { %2235 = vmatmul.msk.bf16.gmra.mxu2 %vm1029_vm0, %v541_v34  ;;  %v365_v34 = vld [vmem:[%s2777_s16 + $0x220] sm:$0xff]  ;;  %v555_v48 = vpack.c.bf16 %v366_v36, %v359_v35 }
 0x183   : > { %v1364_v5 = vpop.f32.mrf.mxu3 }
 0x184   : > { %v3207_v40 = vadd.f32 %v1364_v5, %v3060_v19 }
 0x185   : > { %v1305_v39 = vpop.f32.mrf.mxu2  ;;  %v1129_v43 = vpop.f32.mrf.mxu0 }
 0x186   : > { %v3209_v42 = vadd.f32 %v1305_v39, %v1217_v38  ;;  %v1130_v44 = vadd.f32 %v3008_v9, %v1129_v43  ;;  %v1218_v46 = vpop.f32.mrf.mxu1  ;;  %v608_v39 = vpack.c.bf16 %v475_v23, %v468_v25  ;;  %v553_v43 = vpack.c.bf16 %v364_v3, %v357_v27 }
 0x188   : > { %v1219_v47 = vadd.f32 %v1218_v46, %v1130_v44 }
 0x18b   : > { %v1366_v60 = vpop.f32.mrf.mxu3 }
 0x18c   : > { %v3221_v19 = vadd.f32 %v1366_v60, %v3080_v41 }
 0x18d   : > { %v1307_v63 = vpop.f32.mrf.mxu2  ;;  %v1132_v6 = vpop.f32.mrf.mxu0 }
 0x18e   : > { %v3223_v1 = vadd.f32 %v1307_v63, %v1219_v47  ;;  %v1133_v10 = vadd.f32 %v3008_v9, %v1132_v6  ;;  %v1221_v11 = vpop.f32.mrf.mxu1  ;;  %v554_v47 = vpack.c.bf16 %v365_v34, %v358_v31  ;;  %v489_v6 = vld [vmem:[%s2777_s16 + $0x600] sm:$0xff] }
 0x190   : > { %v1222_v12 = vadd.f32 %v1221_v11, %v1133_v10  ;;  %1408 = vmatmul.bf16.gmra.mxu3 %v601_v0  ;;  %1457 = vmatmul.bf16.gmra.mxu0 %v546_v45  ;;  %v482_v45 = vld [vmem:[%s2777_s16 + $0x5c8] sm:$0xff]  ;;  %v372_v10 = vld [vmem:[%s2777_s16 + $0x258] sm:$0xff]  ;;  %v379_v11 = vld [vmem:[%s2777_s16 + $0x290] sm:$0xff] }
 0x191   : > { %1546 = vmatmul.bf16.gmra.mxu1 %v547_v7  ;;  %v371_v7 = vld [vmem:[%s2777_s16 + $0x250] sm:$0xff]  ;;  %v561_v25 = vpack.c.bf16 %v379_v11, %v372_v10 }
 0x192   : > { %2236 = vmatmul.msk.bf16.gmra.mxu2 %vm1029_vm0, %v548_v8  ;;  %v378_v8 = vld [vmem:[%s2777_s16 + $0x288] sm:$0xff] }
 0x193   : > { %v1369_v41 = vpop.f32.mrf.mxu3 }
 0x194   : > { %v3228_v14 = vadd.f32 %v1369_v41, %v3093_v56  ;;  %v380_v41 = vld [vmem:[%s2777_s16 + $0x298] sm:$0xff] }
 0x195   : > { %v1310_v13 = vpop.f32.mrf.mxu2  ;;  %v1134_v16 = vpop.f32.mrf.mxu0 }
 0x196   : > { %v3230_v15 = vadd.f32 %v1310_v13, %v1222_v12  ;;  %v1135_v21 = vadd.f32 %v3008_v9, %v1134_v16  ;;  %v1223_v22 = vpop.f32.mrf.mxu1  ;;  %v373_v12 = vld [vmem:[%s2777_s16 + $0x260] sm:$0xff] }
 0x197   : > { %v562_v23 = vpack.c.bf16 %v380_v41, %v373_v12 }
 0x198   : > { %v1224_v24 = vadd.f32 %v1223_v22, %v1135_v21  ;;  %v560_v21 = vpack.c.bf16 %v378_v8, %v371_v7 }
 0x19b   : > { %v1371_v38 = vpop.f32.mrf.mxu3 }
 0x19c   : > { %v3242_v56 = vadd.f32 %v1371_v38, %v3120_v18 }
 0x19d   : > { %v1312_v5 = vpop.f32.mrf.mxu2  ;;  %v1137_v46 = vpop.f32.mrf.mxu0 }
 0x19e   : > { %v3244_v44 = vadd.f32 %v1312_v5, %v1224_v24  ;;  %v1138_v49 = vadd.f32 %v3008_v9, %v1137_v46  ;;  %v1226_v53 = vpop.f32.mrf.mxu1  ;;  %v496_v46 = vld [vmem:[%s2777_s16 + $0x638] sm:$0xff] }
 0x1a0   : > { %v1227_v55 = vadd.f32 %v1226_v53, %v1138_v49  ;;  %1413 = vmatmul.bf16.gmra.mxu3 %v608_v39  ;;  %1462 = vmatmul.bf16.gmra.mxu0 %v553_v43  ;;  %v392_v49 = vld [vmem:[%s2777_s16 + $0x2f8] sm:$0xff]  ;;  %v386_v53 = vld [vmem:[%s2777_s16 + $0x2c8] sm:$0xff] }
 0x1a1   : > { %1551 = vmatmul.bf16.gmra.mxu1 %v554_v47  ;;  %v503_v47 = vld [vmem:[%s2777_s16 + $0x670] sm:$0xff] }
 0x1a2   : > { %2237 = vmatmul.msk.bf16.gmra.mxu2 %vm1029_vm0, %v555_v48  ;;  %v385_v48 = vld [vmem:[%s2777_s16 + $0x2c0] sm:$0xff] }
 0x1a3   : > { %v1374_v18 = vpop.f32.mrf.mxu3 }
 0x1a4   : > { %v3249_v58 = vadd.f32 %v1374_v18, %v3126_v30  ;;  %v615_v30 = vpack.c.bf16 %v489_v6, %v482_v45  ;;  %v387_v18 = vld [vmem:[%s2777_s16 + $0x2d0] sm:$0xff] }
 0x1a5   : > { %v1315_v52 = vpop.f32.mrf.mxu2  ;;  %v1139_v37 = vpop.f32.mrf.mxu0 }
 0x1a6   : > { %v3251_v59 = vadd.f32 %v1315_v52, %v1227_v55  ;;  %v1140_v60 = vadd.f32 %v3008_v9, %v1139_v37  ;;  %v1228_v63 = vpop.f32.mrf.mxu1  ;;  %v393_v55 = vld [vmem:[%s2777_s16 + $0x300] sm:$0xff]  ;;  %v394_v52 = vld [vmem:[%s2777_s16 + $0x308] sm:$0xff] }
 0x1a7   : > { %v568_v7 = vpack.c.bf16 %v393_v55, %v386_v53  ;;  %v569_v8 = vpack.c.bf16 %v394_v52, %v387_v18 }
 0x1a8   : > { %v1229_v0 = vadd.f32 %v1228_v63, %v1140_v60  ;;  %v622_v63 = vpack.c.bf16 %v503_v47, %v496_v46 }
 0x1ab   : > { %v3262_v13 = vpop.f32.mrf.mxu3 }
 0x1ad   : > { %v1317_v16 = vpop.f32.mrf.mxu2  ;;  %v1142_v24 = vpop.f32.mrf.mxu0 }
 0x1ae   : > { %v3264_v22 = vadd.f32 %v1317_v16, %v1229_v0  ;;  %v1143_v27 = vadd.f32 %v3008_v9, %v1142_v24  ;;  %v1231_v3 = vpop.f32.mrf.mxu1  ;;  %v567_v0 = vpack.c.bf16 %v392_v49, %v385_v48 }
 0x1b0   : > { %v1232_v31 = vadd.f32 %v1231_v3, %v1143_v27  ;;  %1418 = vmatmul.bf16.gmra.mxu3 %v615_v30  ;;  %1467 = vmatmul.bf16.gmra.mxu0 %v560_v21  ;;  %v510_v27 = vld [vmem:[%s2777_s16 + $0x6a8] sm:$0xff]  ;;  %v517_v3 = vld [vmem:[%s2777_s16 + $0x6e0] sm:$0xff] }
 0x1b1   : > { %1556 = vmatmul.bf16.gmra.mxu1 %v561_v25  ;;  %v629_v48 = vpack.c.bf16 %v517_v3, %v510_v27  ;;  %v414_v27 = vld [vmem:[%s2777_s16 + $0x3a8] sm:$0xff]  ;;  %v421_v3 = vld [vmem:[%s2777_s16 + $0x3e0] sm:$0xff] }
 0x1b2   : > { %2238 = vmatmul.msk.bf16.gmra.mxu2 %vm1029_vm0, %v562_v23 }
 0x1b3   : > { %v3268_v34 = vpop.f32.mrf.mxu3 }
 0x1b5   : > { %v1320_v35 = vpop.f32.mrf.mxu2  ;;  %v1144_v38 = vpop.f32.mrf.mxu0 }
 0x1b6   : > { %v3270_v36 = vadd.f32 %v1320_v35, %v1232_v31  ;;  %v1145_v5 = vadd.f32 %v3008_v9, %v1144_v38  ;;  %v1233_v39 = vpop.f32.mrf.mxu1  ;;  %v399_v31 = vld [vmem:[%s2777_s16 + $0x330] sm:$0xff]  ;;  %v406_v35 = vld [vmem:[%s2777_s16 + $0x368] sm:$0xff]  ;;  %v400_v38 = vld [vmem:[%s2777_s16 + $0x338] sm:$0xff] }
 0x1b7   : > { %v574_v49 = vpack.c.bf16 %v406_v35, %v399_v31 }
 0x1b8   : > { %v1234_v43 = vadd.f32 %v1233_v39, %v1145_v5  ;;  %v407_v5 = vld [vmem:[%s2777_s16 + $0x370] sm:$0xff]  ;;  %v401_v39 = vld [vmem:[%s2777_s16 + $0x340] sm:$0xff] }
 0x1b9   : > { %v575_v18 = vpack.c.bf16 %v407_v5, %v400_v38 }
 0x1bb   : > { %v3281_v37 = vpop.f32.mrf.mxu3 }
 0x1bd   : > { %v1322_v60 = vpop.f32.mrf.mxu2  ;;  %v1147_v6 = vpop.f32.mrf.mxu0 }
 0x1be   : > { %v3283_v45 = vadd.f32 %v1322_v60, %v1234_v43  ;;  %v1148_v10 = vadd.f32 %v3008_v9, %v1147_v6  ;;  %v1236_v11 = vpop.f32.mrf.mxu1  ;;  %v408_v43 = vld [vmem:[%s2777_s16 + $0x378] sm:$0xff] }
 0x1bf   : > { %v576_v52 = vpack.c.bf16 %v408_v43, %v401_v39 }
 0x1c0   : > { %v1237_v12 = vadd.f32 %v1236_v11, %v1148_v10  ;;  %1423 = vmatmul.bf16.gmra.mxu3 %v622_v63  ;;  %1472 = vmatmul.bf16.gmra.mxu0 %v567_v0 }
 0x1c1   : > { %1561 = vmatmul.bf16.gmra.mxu1 %v568_v7 }
 0x1c2   : > { %2239 = vmatmul.msk.bf16.gmra.mxu2 %vm1029_vm0, %v569_v8 }
 0x1c3   : > { %v3287_v41 = vpop.f32.mrf.mxu3 }
 0x1c5   : > { %v1325_v16 = vpop.f32.mrf.mxu2  ;;  %v1149_v21 = vpop.f32.mrf.mxu0 }
 0x1c6   : > { %v3289_v30 = vadd.f32 %v1325_v16, %v1237_v12  ;;  %v1150_v24 = vadd.f32 %v3008_v9, %v1149_v21  ;;  %v1238_v25 = vpop.f32.mrf.mxu1  ;;  %v413_v21 = vld [vmem:[%s2777_s16 + $0x3a0] sm:$0xff] }
 0x1c8   : > { %v1239_v23 = vadd.f32 %v1238_v25, %v1150_v24  ;;  %v420_v24 = vld [vmem:[%s2777_s16 + $0x3d8] sm:$0xff]  ;;  %v415_v25 = vld [vmem:[%s2777_s16 + $0x3b0] sm:$0xff] }
 0x1c9   : > { %v581_v38 = vpack.c.bf16 %v420_v24, %v413_v21  ;;  %v428_v21 = vld [vmem:[%s2777_s16 + $0x418] sm:$0xff]  ;;  %v435_v24 = vld [vmem:[%s2777_s16 + $0x450] sm:$0xff] }
 0x1cb   : > { %v3300_v46 = vpop.f32.mrf.mxu3 }
 0x1cd   : > { %v1327_v47 = vpop.f32.mrf.mxu2  ;;  %v1152_v55 = vpop.f32.mrf.mxu0 }
 0x1ce   : > { %v3302_v53 = vadd.f32 %v1327_v47, %v1239_v23  ;;  %v1153_v60 = vadd.f32 %v3008_v9, %v1152_v55  ;;  %v1241_v63 = vpop.f32.mrf.mxu1  ;;  %v422_v23 = vld [vmem:[%s2777_s16 + $0x3e8] sm:$0xff]  ;;  %v582_v47 = vpack.c.bf16 %v421_v3, %v414_v27 }
 0x1cf   : > { %v583_v43 = vpack.c.bf16 %v422_v23, %v415_v25 }
 0x1d0   : > { %v1242_v0 = vadd.f32 %v1241_v63, %v1153_v60  ;;  %1428 = vmatmul.bf16.gmra.mxu3 %v629_v48  ;;  %1477 = vmatmul.bf16.gmra.mxu0 %v574_v49 }
 0x1d1   : > { %1566 = vmatmul.bf16.gmra.mxu1 %v575_v18 }
 0x1d2   : > { %2240 = vmatmul.msk.bf16.gmra.mxu2 %vm1029_vm0, %v576_v52 }
 0x1d3   : > { %v3306_v6 = vpop.f32.mrf.mxu3 }
 0x1d5   : > { %v1330_v7 = vpop.f32.mrf.mxu2  ;;  %v1154_v10 = vpop.f32.mrf.mxu0 }
 0x1d6   : > { %v3308_v8 = vadd.f32 %v1330_v7, %v1242_v0  ;;  %v1155_v11 = vadd.f32 %v3008_v9, %v1154_v10  ;;  %v1243_v12 = vpop.f32.mrf.mxu1  ;;  %v427_v10 = vld [vmem:[%s2777_s16 + $0x410] sm:$0xff] }
 0x1d8   : > { %v1244_v16 = vadd.f32 %v1243_v12, %v1155_v11  ;;  %v434_v11 = vld [vmem:[%s2777_s16 + $0x448] sm:$0xff]  ;;  %v429_v12 = vld [vmem:[%s2777_s16 + $0x420] sm:$0xff] }
 0x1db   : > { %v3317_v31 = vpop.f32.mrf.mxu3 }
 0x1dd   : > { %v1332_v35 = vpop.f32.mrf.mxu2  ;;  %v1443_v39 = vpop.f32.mrf.mxu0 }
 0x1de   : > { %v3319_v5 = vadd.f32 %v1332_v35, %v1244_v16  ;;  %v1444_v9 = vadd.f32 %v1443_v39, %v3165_v32  ;;  %v1532_v48 = vpop.f32.mrf.mxu1  ;;  %v436_v16 = vld [vmem:[%s2777_s16 + $0x458] sm:$0xff]  ;;  %v589_v39 = vpack.c.bf16 %v435_v24, %v428_v21  ;;  %v449_v21 = vld [vmem:[%s2777_s16 + $0x4c0] sm:$0xff] }
 0x1e0   : > { %v1533_v49 = vadd.f32 %v1532_v48, %v1444_v9  ;;  %1482 = vmatmul.bf16.gmra.mxu0 %v581_v38  ;;  %v590_v38 = vpack.c.bf16 %v436_v16, %v429_v12  ;;  %v450_v12 = vld [vmem:[%s2777_s16 + $0x4c8] sm:$0xff] }
 0x1e1   : > { %1571 = vmatmul.bf16.gmra.mxu1 %v582_v47  ;;  %v442_v16 = vld [vmem:[%s2777_s16 + $0x488] sm:$0xff] }
 0x1e2   : > { %2241 = vmatmul.msk.bf16.gmra.mxu2 %vm1029_vm0, %v583_v43 }
 0x1e3   : > { %v1394_v55 = vpop.f32.mrf.mxu3 }
 0x1e4   : > { %v3324_v18 = vadd.f32 %v1394_v55, %v3209_v42  ;;  %v588_v42 = vpack.c.bf16 %v434_v11, %v427_v10  ;;  %v448_v10 = vld [vmem:[%s2777_s16 + $0x4b8] sm:$0xff]  ;;  %v443_v11 = vld [vmem:[%s2777_s16 + $0x490] sm:$0xff] }
 0x1e5   : > { %v1621_v52 = vpop.f32.mrf.mxu2  ;;  %v1445_v63 = vpop.f32.mrf.mxu0 }
 0x1e6   : > { %v1622_v60 = vadd.f32 %v1621_v52, %v1533_v49  ;;  %v1446_v0 = vadd.f32 %v1445_v63, %v3179_v26  ;;  %v1534_v32 = vpop.f32.mrf.mxu1 }
 0x1e8   : > { %v1535_v7 = vadd.f32 %v1534_v32, %v1446_v0  ;;  %v1701_v47 = vmax.f32 %v1622_v60, 0.0 }
 0x1eb   : > { %v1396_v25 = vpop.f32.mrf.mxu3 }
 0x1ec   : > { %v3334_v23 = vadd.f32 %v1396_v25, %v3223_v1 }
 0x1ed   : > { %v1623_v27 = vpop.f32.mrf.mxu2  ;;  %v1448_v35 = vpop.f32.mrf.mxu0 }
 0x1ee   : > { %v1624_v3 = vadd.f32 %v1623_v27, %v1535_v7  ;;  %v1449_v26 = vadd.f32 %v1448_v35, %v3186_v2  ;;  %v1537_v43 = vpop.f32.mrf.mxu1  ;;  %v441_v7 = vld [vmem:[%s2777_s16 + $0x480] sm:$0xff]  ;;  %v597_v35 = vpack.c.bf16 %v450_v12, %v443_v11  ;;  %v456_v11 = vld [vmem:[%s2777_s16 + $0x4f8] sm:$0xff]  ;;  %v463_v12 = vld [vmem:[%s2777_s16 + $0x530] sm:$0xff] }
 0x1f0   : > { %v1702_v9 = vmax.f32 %v1624_v3, 0.0  ;;  %v1538_v48 = vadd.f32 %v1537_v43, %v1449_v26  ;;  %1487 = vmatmul.bf16.gmra.mxu0 %v588_v42 }
 0x1f1   : > { %1576 = vmatmul.bf16.gmra.mxu1 %v589_v39 }
 0x1f2   : > { %2242 = vmatmul.msk.bf16.gmra.mxu2 %vm1029_vm0, %v590_v38  ;;  %v3338_v1 = vpack.c.bf16 %v1702_v9, %v1701_v47  ;;  %v596_v38 = vpack.c.bf16 %v449_v21, %v442_v16 }
 0x1f3   : > { %v1399_v49 = vpop.f32.mrf.mxu3 }
 0x1f4   : > { %v3341_v55 = vadd.f32 %v1399_v49, %v3230_v15  ;;  %v595_v15 = vpack.c.bf16 %v448_v10, %v441_v7  ;;  %v457_v7 = vld [vmem:[%s2777_s16 + $0x500] sm:$0xff]  ;;  %v464_v10 = vld [vmem:[%s2777_s16 + $0x538] sm:$0xff] }
 0x1f5   : > { %v1626_v2 = vpop.f32.mrf.mxu2  ;;  %v1450_v60 = vpop.f32.mrf.mxu0 }
 0x1f6   : > { %v1627_v52 = vadd.f32 %v1626_v2, %v1538_v48  ;;  %v1451_v63 = vadd.f32 %v1450_v60, %v3200_v54  ;;  %v1539_v0 = vpop.f32.mrf.mxu1 }
 0x1f8   : > { %v1540_v32 = vadd.f32 %v1539_v0, %v1451_v63  ;;  %v1703_v26 = vmax.f32 %v1627_v52, 0.0  ;;  %v455_v0 = vld [vmem:[%s2777_s16 + $0x4f0] sm:$0xff] }
 0x1fb   : > { %v1401_v24 = vpop.f32.mrf.mxu3 }
 0x1fc   : > { %v3351_v25 = vadd.f32 %v1401_v24, %v3244_v44 }
 0x1fd   : > { %v1628_v27 = vpop.f32.mrf.mxu2  ;;  %v1453_v3 = vpop.f32.mrf.mxu0 }
 0x1fe   : > { %v1629_v42 = vadd.f32 %v1628_v27, %v1540_v32  ;;  %v1454_v54 = vadd.f32 %v1453_v3, %v3207_v40  ;;  %v1542_v39 = vpop.f32.mrf.mxu1  ;;  %v462_v32 = vld [vmem:[%s2777_s16 + $0x528] sm:$0xff]  ;;  %v603_v3 = vpack.c.bf16 %v463_v12, %v456_v11 }
 0x200   : > { %v1704_v43 = vmax.f32 %v1629_v42, 0.0  ;;  %v1543_v47 = vadd.f32 %v1542_v39, %v1454_v54  ;;  %1492 = vmatmul.bf16.gmra.mxu0 %v595_v15  ;;  %v604_v42 = vpack.c.bf16 %v464_v10, %v457_v7  ;;  %v477_v7 = vld [vmem:[%s2777_s16 + $0x5a0] sm:$0xff] }
 0x201   : > { %1581 = vmatmul.bf16.gmra.mxu1 %v596_v38 }
 0x202   : > { %2243 = vmatmul.msk.bf16.gmra.mxu2 %vm1029_vm0, %v597_v35  ;;  %v3355_v44 = vpack.c.bf16 %v1704_v43, %v1703_v26 }
 0x203   : > { %v1404_v9 = vpop.f32.mrf.mxu3 }
 0x204   : > { %v3358_v48 = vadd.f32 %v1404_v9, %v3251_v59  ;;  %v602_v59 = vpack.c.bf16 %v462_v32, %v455_v0  ;;  %v478_v0 = vld [vmem:[%s2777_s16 + $0x5a8] sm:$0xff] }
 0x205   : > { %v1631_v40 = vpop.f32.mrf.mxu2  ;;  %v1455_v2 = vpop.f32.mrf.mxu0  ;;  %v470_v32 = vld [vmem:[%s2777_s16 + $0x568] sm:$0xff] }
 0x206   : > { %v1632_v49 = vadd.f32 %v1631_v40, %v1543_v47  ;;  %v1456_v52 = vadd.f32 %v1455_v2, %v3221_v19  ;;  %v1544_v60 = vpop.f32.mrf.mxu1 }
 0x208   : > { %v1545_v63 = vadd.f32 %v1544_v60, %v1456_v52  ;;  %v1705_v38 = vmax.f32 %v1632_v49, 0.0  ;;  %v469_v52 = vld [vmem:[%s2777_s16 + $0x560] sm:$0xff]  ;;  %v476_v60 = vld [vmem:[%s2777_s16 + $0x598] sm:$0xff] }
 0x20b   : > { %v1406_v16 = vpop.f32.mrf.mxu3 }
 0x20c   : > { %v3368_v21 = vadd.f32 %v1406_v16, %v3264_v22 }
 0x20d   : > { %v1633_v24 = vpop.f32.mrf.mxu2  ;;  %v1458_v15 = vpop.f32.mrf.mxu0 }
 0x20e   : > { %v1634_v27 = vadd.f32 %v1633_v24, %v1545_v63  ;;  %v1459_v19 = vadd.f32 %v1458_v15, %v3228_v14  ;;  %v1547_v35 = vpop.f32.mrf.mxu1  ;;  %v471_v63 = vld [vmem:[%s2777_s16 + $0x570] sm:$0xff] }
 0x210   : > { %v1706_v54 = vmax.f32 %v1634_v27, 0.0  ;;  %v1548_v39 = vadd.f32 %v1547_v35, %v1459_v19  ;;  %1497 = vmatmul.bf16.gmra.mxu0 %v602_v59  ;;  %v611_v59 = vpack.c.bf16 %v478_v0, %v471_v63  ;;  %v610_v27 = vpack.c.bf16 %v477_v7, %v470_v32  ;;  %v491_v63 = vld [vmem:[%s2777_s16 + $0x610] sm:$0xff] }
 0x211   : > { %1586 = vmatmul.bf16.gmra.mxu1 %v603_v3 }
 0x212   : > { %2244 = vmatmul.msk.bf16.gmra.mxu2 %vm1029_vm0, %v604_v42  ;;  %v3372_v22 = vpack.c.bf16 %v1706_v54, %v1705_v38 }
 0x213   : > { %v1409_v26 = vpop.f32.mrf.mxu3 }
 0x214   : > { %v3375_v43 = vadd.f32 %v1409_v26, %v3270_v36  ;;  %v609_v36 = vpack.c.bf16 %v476_v60, %v469_v52  ;;  %v492_v52 = vld [vmem:[%s2777_s16 + $0x618] sm:$0xff] }
 0x215   : > { %v1636_v14 = vpop.f32.mrf.mxu2  ;;  %v1460_v9 = vpop.f32.mrf.mxu0  ;;  %v484_v60 = vld [vmem:[%s2777_s16 + $0x5d8] sm:$0xff] }
 0x216   : > { %v1637_v47 = vadd.f32 %v1636_v14, %v1548_v39  ;;  %v1461_v40 = vadd.f32 %v1460_v9, %v3242_v56  ;;  %v1549_v49 = vpop.f32.mrf.mxu1 }
 0x218   : > { %v1550_v2 = vadd.f32 %v1549_v49, %v1461_v40  ;;  %v1707_v42 = vmax.f32 %v1637_v47, 0.0  ;;  %v483_v40 = vld [vmem:[%s2777_s16 + $0x5d0] sm:$0xff]  ;;  %v490_v49 = vld [vmem:[%s2777_s16 + $0x608] sm:$0xff] }
 0x21b   : > { %v1411_v10 = vpop.f32.mrf.mxu3 }
 0x21c   : > { %v3385_v11 = vadd.f32 %v1411_v10, %v3283_v45 }
 0x21d   : > { %v1638_v12 = vpop.f32.mrf.mxu2  ;;  %v1463_v24 = vpop.f32.mrf.mxu0 }
 0x21e   : > { %v1639_v16 = vadd.f32 %v1638_v12, %v1550_v2  ;;  %v1464_v56 = vadd.f32 %v1463_v24, %v3249_v58  ;;  %v1552_v15 = vpop.f32.mrf.mxu1  ;;  %v1377_v58 = vadd.f32 %v3262_v13, %v3140_v50  ;;  %v485_v2 = vld [vmem:[%s2777_s16 + $0x5e0] sm:$0xff]  ;;  %v616_v13 = vpack.c.bf16 %v490_v49, %v483_v40 }
 0x21f   : > { %v618_v10 = vpack.c.bf16 %v492_v52, %v485_v2  ;;  %v617_v12 = vpack.c.bf16 %v491_v63, %v484_v60 }
 0x220   : > { %v1708_v3 = vmax.f32 %v1639_v16, 0.0  ;;  %v1553_v19 = vadd.f32 %v1552_v15, %v1464_v56  ;;  %1502 = vmatmul.bf16.gmra.mxu0 %v609_v36  ;;  %v1382_v56 = vadd.f32 %v3281_v37, %v3160_v20 }
 0x221   : > { %1591 = vmatmul.bf16.gmra.mxu1 %v610_v27 }
 0x222   : > { %2245 = vmatmul.msk.bf16.gmra.mxu2 %vm1029_vm0, %v611_v59  ;;  %v3389_v45 = vpack.c.bf16 %v1708_v3, %v1707_v42 }
 0x223   : > { %v1414_v35 = vpop.f32.mrf.mxu3 }
 0x224   : > { %v3394_v38 = vadd.f32 %v1414_v35, %v3289_v30 }
 0x225   : > { %v1641_v54 = vpop.f32.mrf.mxu2  ;;  %v1465_v26 = vpop.f32.mrf.mxu0 }
 0x226   : > { %v1642_v39 = vadd.f32 %v1641_v54, %v1553_v19  ;;  %v1466_v14 = vadd.f32 %v1465_v26, %v1377_v58  ;;  %v1554_v47 = vpop.f32.mrf.mxu1  ;;  %v497_v58 = vld [vmem:[%s2777_s16 + $0x640] sm:$0xff]  ;;  %v504_v54 = vld [vmem:[%s2777_s16 + $0x678] sm:$0xff]  ;;  %v506_v26 = vld [vmem:[%s2777_s16 + $0x688] sm:$0xff] }
 0x227   : > { %v623_v2 = vpack.c.bf16 %v504_v54, %v497_v58 }
 0x228   : > { %v1555_v9 = vadd.f32 %v1554_v47, %v1466_v14  ;;  %v1709_v16 = vmax.f32 %v1642_v39, 0.0  ;;  %v499_v39 = vld [vmem:[%s2777_s16 + $0x650] sm:$0xff]  ;;  %v498_v14 = vld [vmem:[%s2777_s16 + $0x648] sm:$0xff]  ;;  %v505_v47 = vld [vmem:[%s2777_s16 + $0x680] sm:$0xff] }
 0x229   : > { %v625_v52 = vpack.c.bf16 %v506_v26, %v499_v39  ;;  %v624_v60 = vpack.c.bf16 %v505_v47, %v498_v14  ;;  %v1390_v47 = vadd.f32 %v3306_v6, %v3188_v4 }
 0x22b   : > { %v1416_v0 = vpop.f32.mrf.mxu3 }
 0x22c   : > { %v3403_v32 = vadd.f32 %v1416_v0, %v3302_v53  ;;  %v1380_v53 = vadd.f32 %v3268_v34, %v3146_v62 }
 0x22d   : > { %v1643_v50 = vpop.f32.mrf.mxu2  ;;  %v1468_v7 = vpop.f32.mrf.mxu0 }
 0x22e   : > { %v1644_v30 = vadd.f32 %v1643_v50, %v1555_v9  ;;  %v1557_v36 = vpop.f32.mrf.mxu1  ;;  %v1469_v15 = vadd.f32 %v1468_v7, %v1380_v53  ;;  %v1385_v50 = vadd.f32 %v3287_v41, %v3167_v33  ;;  %v518_v53 = vld [vmem:[%s2777_s16 + $0x6e8] sm:$0xff] }
 0x230   : > { %v1710_v24 = vmax.f32 %v1644_v30, 0.0  ;;  %1507 = vmatmul.bf16.gmra.mxu0 %v616_v13  ;;  %v1558_v35 = vadd.f32 %v1557_v36, %v1469_v15  ;;  %v1387_v30 = vadd.f32 %v3300_v46, %v3181_v57  ;;  %v512_v15 = vld [vmem:[%s2777_s16 + $0x6b8] sm:$0xff] }
 0x231   : > { %1596 = vmatmul.bf16.gmra.mxu1 %v617_v12 }
 0x232   : > { %v3405_v59 = vpack.c.bf16 %v1710_v24, %v1709_v16  ;;  %2246 = vmatmul.msk.bf16.gmra.mxu2 %vm1029_vm0, %v618_v10  ;;  %v511_v24 = vld [vmem:[%s2777_s16 + $0x6b0] sm:$0xff] }
 0x233   : > { %v630_v58 = vpack.c.bf16 %v518_v53, %v511_v24 }
 0x235   : > { %v1646_v27 = vpop.f32.mrf.mxu2  ;;  %v1470_v42 = vpop.f32.mrf.mxu0 }
 0x236   : > { %v1559_v3 = vpop.f32.mrf.mxu1  ;;  %v1471_v19 = vadd.f32 %v1470_v42, %v1382_v56  ;;  %v1647_v9 = vadd.f32 %v1646_v27, %v1558_v35  ;;  %v513_v27 = vld [vmem:[%s2777_s16 + $0x6c0] sm:$0xff]  ;;  %v520_v56 = vld [vmem:[%s2777_s16 + $0x6f8] sm:$0xff]  ;;  %v519_v42 = vld [vmem:[%s2777_s16 + $0x6f0] sm:$0xff] }
 0x237   : > { %v632_v54 = vpack.c.bf16 %v520_v56, %v513_v27  ;;  %v631_v39 = vpack.c.bf16 %v519_v42, %v512_v15 }
 0x238   : > { %v1560_v40 = vadd.f32 %v1559_v3, %v1471_v19  ;;  %v1711_v37 = vmax.f32 %v1647_v9, 0.0 }
 0x23d   : > { %v1648_v49 = vpop.f32.mrf.mxu2  ;;  %v1473_v34 = vpop.f32.mrf.mxu0 }
 0x23e   : > { %v1649_v62 = vadd.f32 %v1648_v49, %v1560_v40  ;;  %v1562_v20 = vpop.f32.mrf.mxu1  ;;  %v1474_v7 = vadd.f32 %v1473_v34, %v1385_v50  ;;  %v1392_v40 = vadd.f32 %v3317_v31, %v3202_v28 }
 0x240   : > { %v1712_v63 = vmax.f32 %v1649_v62, 0.0  ;;  %1512 = vmatmul.bf16.gmra.mxu0 %v623_v2  ;;  %v1563_v16 = vadd.f32 %v1562_v20, %v1474_v7 }
 0x241   : > { %1601 = vmatmul.bf16.gmra.mxu1 %v624_v60 }
 0x242   : > { %v3418_v0 = vpack.c.bf16 %v1712_v63, %v1711_v37  ;;  %2247 = vmatmul.msk.bf16.gmra.mxu2 %vm1029_vm0, %v625_v52 }
 0x245   : > { %v1651_v13 = vpop.f32.mrf.mxu2  ;;  %v1475_v10 = vpop.f32.mrf.mxu0 }
 0x246   : > { %v1564_v12 = vpop.f32.mrf.mxu1  ;;  %v1476_v36 = vadd.f32 %v1475_v10, %v1387_v30  ;;  %v1652_v3 = vadd.f32 %v1651_v13, %v1563_v16 }
 0x248   : > { %v1565_v19 = vadd.f32 %v1564_v12, %v1476_v36  ;;  %v1713_v46 = vmax.f32 %v1652_v3, 0.0 }
 0x24d   : > { %v1653_v35 = vpop.f32.mrf.mxu2  ;;  %v1478_v41 = vpop.f32.mrf.mxu0 }
 0x24e   : > { %v1654_v33 = vadd.f32 %v1653_v35, %v1565_v19  ;;  %v1567_v57 = vpop.f32.mrf.mxu1  ;;  %v1479_v49 = vadd.f32 %v1478_v41, %v1390_v47  ;;  %v1788_v41 = vsel %vm1768_vm1, %v3418_v0, 0 }
 0x250   : > { %v1714_v26 = vmax.f32 %v1654_v33, 0.0  ;;  %1517 = vmatmul.bf16.gmra.mxu0 %v630_v58  ;;  %v1568_v52 = vadd.f32 %v1567_v57, %v1479_v49 }
 0x251   : > { %1606 = vmatmul.bf16.gmra.mxu1 %v631_v39 }
 0x252   : > { %v1741_v14 = vpack.c.bf16 %v1714_v26, %v1713_v46  ;;  %2248 = vmatmul.msk.bf16.gmra.mxu2 %vm1029_vm0, %v632_v54 }
 0x254   : > { %v1791_v27 = vsel %vm1768_vm1, %v1741_v14, 0 }
 0x255   : > { %v1656_v9 = vpop.f32.mrf.mxu2  ;;  %v1480_v2 = vpop.f32.mrf.mxu0 }
 0x256   : > { %v1569_v62 = vpop.f32.mrf.mxu1  ;;  %v1481_v34 = vadd.f32 %v1480_v2, %v1392_v40  ;;  %v1657_v60 = vadd.f32 %v1656_v9, %v1568_v52 }
 0x258   : > { %v1570_v20 = vadd.f32 %v1569_v62, %v1481_v34  ;;  %v1715_v7 = vmax.f32 %v1657_v60, 0.0 }
 0x25d   : > { %v1658_v37 = vpop.f32.mrf.mxu2  ;;  %v1483_v50 = vpop.f32.mrf.mxu0 }
 0x25e   : > { %v1659_v63 = vadd.f32 %v1658_v37, %v1570_v20  ;;  %v1484_v13 = vadd.f32 %v1483_v50, %v3324_v18  ;;  %v1572_v30 = vpop.f32.mrf.mxu1 }
 0x260   : > { %v1716_v10 = vmax.f32 %v1659_v63, 0.0  ;;  %v1573_v4 = vadd.f32 %v1572_v30, %v1484_v13 }
 0x262   : > { %v1742_v6 = vpack.c.bf16 %v1716_v10, %v1715_v7 }
 0x264   : > { %v1794_v28 = vsel %vm1768_vm1, %v1742_v6, 0 }
 0x265   : > { %v1661_v31 = vpop.f32.mrf.mxu2  ;;  %1820 = vmatpush.bf16.xpose.msra.mxu3 %v1794_v28  ;;  %v1485_v36 = vpop.f32.mrf.mxu0 }
 0x266   : > { %v1662_v12 = vadd.f32 %v1661_v31, %v1573_v4  ;;  %v1486_v16 = vadd.f32 %v1485_v36, %v3334_v23  ;;  %v1574_v24 = vpop.f32.mrf.mxu1 }
 0x268   : > { %v1575_v53 = vadd.f32 %v1574_v24, %v1486_v16  ;;  %v1717_v19 = vmax.f32 %v1662_v12, 0.0 }
 0x26d   : > { %v1663_v56 = vpop.f32.mrf.mxu2  ;;  %1821 = vmatpush.bf16.xpose.msra.mxu3 %v1791_v27  ;;  %v1488_v15 = vpop.f32.mrf.mxu0 }
 0x26e   : > { %v1664_v18 = vadd.f32 %v1663_v56, %v1575_v53  ;;  %v1489_v42 = vadd.f32 %v1488_v15, %v3341_v55  ;;  %v1577_v3 = vpop.f32.mrf.mxu1  ;;  %v1785_v55 = vsel %vm1768_vm1, %v3405_v59, 0 }
 0x270   : > { %v1718_v35 = vmax.f32 %v1664_v18, 0.0  ;;  %v1578_v58 = vadd.f32 %v1577_v3, %v1489_v42  ;;  %v1419_v3 = vpop.f32.mrf.mxu3 }
 0x272   : > { %v3441_v33 = vpack.c.bf16 %v1718_v35, %v1717_v19 }
 0x275   : > { %v1666_v23 = vpop.f32.mrf.mxu2  ;;  %1822 = vmatpush.bf16.xpose.msra.mxu3 %v1788_v41  ;;  %v1490_v39 = vpop.f32.mrf.mxu0 }
 0x276   : > { %v1667_v54 = vadd.f32 %v1666_v23, %v1578_v58  ;;  %v1491_v57 = vadd.f32 %v1490_v39, %v3351_v25  ;;  %v1579_v46 = vpop.f32.mrf.mxu1  ;;  %v1782_v25 = vsel %vm1768_vm1, %v3389_v45, 0 }
 0x278   : > { %v1580_v26 = vadd.f32 %v1579_v46, %v1491_v57  ;;  %v1719_v2 = vmax.f32 %v1667_v54, 0.0  ;;  %v1421_v39 = vpop.f32.mrf.mxu3 }
 0x27d   : > { %v1668_v14 = vpop.f32.mrf.mxu2  ;;  %1823 = vmatpush.bf16.xpose.msra.mxu3 %v1785_v55  ;;  %v1493_v9 = vpop.f32.mrf.mxu0 }
 0x27e   : > { %v1669_v47 = vadd.f32 %v1668_v14, %v1580_v26  ;;  %v1494_v40 = vadd.f32 %v1493_v9, %v3358_v48  ;;  %v1582_v49 = vpop.f32.mrf.mxu1  ;;  %v1779_v48 = vsel %vm1768_vm1, %v3372_v22, 0  ;;  %v1420_v9 = vadd.f32 %v1419_v3, %v3308_v8 }
 0x280   : > { %v1720_v0 = vmax.f32 %v1669_v47, 0.0  ;;  %v1583_v62 = vadd.f32 %v1582_v49, %v1494_v40  ;;  %v1424_v40 = vpop.f32.mrf.mxu3 }
 0x282   : > { %v3449_v34 = vpack.c.bf16 %v1720_v0, %v1719_v2  ;;  %v1422_v2 = vadd.f32 %v1421_v39, %v3319_v5 }
 0x285   : > { %v1671_v52 = vpop.f32.mrf.mxu2  ;;  %1824 = vmatpush.bf16.xpose.msra.mxu3 %v1782_v25  ;;  %v1495_v20 = vpop.f32.mrf.mxu0 }
 0x286   : > { %v1672_v60 = vadd.f32 %v1671_v52, %v1583_v62  ;;  %v1496_v59 = vadd.f32 %v1495_v20, %v3368_v21  ;;  %v1584_v37 = vpop.f32.mrf.mxu1  ;;  %v1776_v21 = vsel %vm1768_vm1, %v3355_v44, 0  ;;  %v2251_v52 = vld [vmem:[#allocation7] sm:$0xf] }
 0x288   : > { %v1585_v63 = vadd.f32 %v1584_v37, %v1496_v59  ;;  %v1721_v4 = vmax.f32 %v1672_v60, 0.0  ;;  %v2314_v60 = vld [vmem:[#allocation7] sm:$0x10] }
 0x289   : > { %v3472_v59 = vor.u32 %v2314_v60, %v2251_v52 }
 0x28d   : > { %v1673_v50 = vpop.f32.mrf.mxu2  ;;  %1825 = vmatpush.bf16.xpose.msra.mxu3 %v1779_v48  ;;  %v1498_v30 = vpop.f32.mrf.mxu0 }
 0x28e   : > { %v1674_v13 = vadd.f32 %v1673_v50, %v1585_v63  ;;  %v1499_v7 = vadd.f32 %v1498_v30, %v3375_v43  ;;  %v1587_v10 = vpop.f32.mrf.mxu1  ;;  %v1773_v43 = vsel %vm1768_vm1, %v3338_v1, 0 }
 0x290   : > { %v1722_v45 = vmax.f32 %v1674_v13, 0.0  ;;  %v1588_v6 = vadd.f32 %v1587_v10, %v1499_v7  ;;  %v1426_v13 = vpop.f32.mrf.mxu3 }
 0x292   : > { %v3457_v28 = vpack.c.bf16 %v1722_v45, %v1721_v4  ;;  %v1425_v4 = vadd.f32 %v1424_v40, %v3124_v29 }
 0x295   : > { %v1676_v31 = vpop.f32.mrf.mxu2  ;;  %1826 = vmatpush.bf16.xpose.msra.mxu3 %v1776_v21  ;;  %v1500_v36 = vpop.f32.mrf.mxu0 }
 0x296   : > { %v1677_v12 = vadd.f32 %v1676_v31, %v1588_v6  ;;  %v1501_v22 = vadd.f32 %v1500_v36, %v3385_v11  ;;  %v1589_v16 = vpop.f32.mrf.mxu1  ;;  %v1427_v6 = vadd.f32 %v1426_v13, %v3138_v17 }
 0x298   : > { %v1590_v24 = vadd.f32 %v1589_v16, %v1501_v22  ;;  %v1723_v42 = vmax.f32 %v1677_v12, 0.0  ;;  %v1429_v22 = vpop.f32.mrf.mxu3 }
 0x29d   : > { %v1678_v53 = vpop.f32.mrf.mxu2  ;;  %1827 = vmatpush.bf16.xpose.msra.mxu3 %v1773_v43  ;;  %v1503_v56 = vpop.f32.mrf.mxu0 }
 0x29e   : > { %v1679_v27 = vadd.f32 %v1678_v53, %v1590_v24  ;;  %v1504_v18 = vadd.f32 %v1503_v56, %v3394_v38  ;;  %v1592_v15 = vpop.f32.mrf.mxu1  ;;  %v1752_v56 = vld [vmem:[%s3582_s4 + $0x8] sm:$0x3] }
 0x2a0   : > { %v1724_v44 = vmax.f32 %v1679_v27, 0.0  ;;  %v1593_v19 = vadd.f32 %v1592_v15, %v1504_v18  ;;  %v2615_v27 = vmov 0   ;;  %v1431_v3 = vpop.f32.mrf.mxu3 }
 0x2a1   : > { %2412 = vset.pattern.permute.xlu0 %v2615_v27 }
 0x2a2   : > { %v3465_v35 = vpack.c.bf16 %v1724_v44, %v1723_v42  ;;  %1760 = vperm.xlu0 %2412, %v1752_v56  }
 0x2a4   : > { %2253 = vmatmul.msk.bf16.vlgmr.msra.gmra.mxu3 %vm1768_vm1, %v3472_v59 }
 0x2a5   : > { %v1681_v58 = vpop.f32.mrf.mxu2  ;;  %v1505_v41 = vpop.f32.mrf.mxu0 }
 0x2a6   : > { %v1682_v11 = vadd.f32 %v1681_v58, %v1593_v19  ;;  %v1506_v23 = vadd.f32 %v1505_v41, %v3403_v32  ;;  %v1594_v54 = vpop.f32.mrf.mxu1  ;;  %v1430_v19 = vadd.f32 %v1429_v22, %v3144_v61  ;;  %v1432_v41 = vadd.f32 %v1431_v3, %v3158_v51 }
 0x2a8   : > { %v1595_v1 = vadd.f32 %v1594_v54, %v1506_v23  ;;  %v1725_v38 = vmax.f32 %v1682_v11, 0.0  ;;  %v1751_v11 = vld [vmem:[%s3582_s4] sm:$0xff] }
 0x2aa   : > { %1755 = vperm.xlu0 %2412, %v1751_v11  }
 0x2ad   : > { %v1683_v57 = vpop.f32.mrf.mxu2  ;;  %v1508_v26 = vpop.f32.mrf.mxu0 }
 0x2ae   : > { %v1684_v46 = vadd.f32 %v1683_v57, %v1595_v1  ;;  %v1597_v55 = vpop.f32.mrf.mxu1  ;;  %v1509_v0 = vadd.f32 %v1508_v26, %v1420_v9 }
 0x2b0   : > { %v1726_v14 = vmax.f32 %v1684_v46, 0.0  ;;  %v1598_v20 = vadd.f32 %v1597_v55, %v1509_v0  ;;  %v1806_v0 = vsel %vm1768_vm1, %v3465_v35, 0 }
 0x2b2   : > { %v3468_v47 = vpack.c.bf16 %v1726_v14, %v1725_v38 }
 0x2b5   : > { %v1686_v49 = vpop.f32.mrf.mxu2  ;;  %v1510_v62 = vpop.f32.mrf.mxu0 }
 0x2b6   : > { %v1599_v32 = vpop.f32.mrf.mxu1  ;;  %v1511_v25 = vadd.f32 %v1510_v62, %v1422_v2  ;;  %v1687_v37 = vadd.f32 %v1686_v49, %v1598_v20  ;;  %v1809_v2 = vsel %vm1768_vm1, %v3468_v47, 0  ;;  %v1803_v62 = vsel %vm1768_vm1, %v3457_v28, 0 }
 0x2b8   : > { %v1600_v63 = vadd.f32 %v1599_v32, %v1511_v25  ;;  %v1727_v5 = vmax.f32 %v1687_v37, 0.0  ;;  %v1800_v32 = vsel %vm1768_vm1, %v3449_v34, 0  ;;  %v1797_v25 = vsel %vm1768_vm1, %v3441_v33, 0 }
 0x2bd   : > { %v1688_v48 = vpop.f32.mrf.mxu2  ;;  %v1513_v50 = vpop.f32.mrf.mxu0 }
 0x2be   : > { %v1689_v8 = vadd.f32 %v1688_v48, %v1600_v63  ;;  %v1602_v30 = vpop.f32.mrf.mxu1  ;;  %v1514_v21 = vadd.f32 %v1513_v50, %v1425_v4 }
 0x2c0   : > { %v1728_v7 = vmax.f32 %v1689_v8, 0.0  ;;  %v1603_v16 = vadd.f32 %v1602_v30, %v1514_v21 }
 0x2c2   : > { %v1748_v10 = vpack.c.bf16 %v1728_v7, %v1727_v5 }
 0x2c4   : > { %v1812_v51 = vsel %vm1768_vm1, %v1748_v10, 0 }
 0x2c5   : > { %v1691_v45 = vpop.f32.mrf.mxu2  ;;  %v1515_v31 = vpop.f32.mrf.mxu0 }
 0x2c6   : > { %v1604_v12 = vpop.f32.mrf.mxu1  ;;  %v1516_v36 = vadd.f32 %v1515_v31, %v1427_v6  ;;  %v1692_v24 = vadd.f32 %v1691_v45, %v1603_v16 }
 0x2c8   : > { %v1605_v43 = vadd.f32 %v1604_v12, %v1516_v36  ;;  %v1729_v15 = vmax.f32 %v1692_v24, 0.0 }
 0x2cd   : > { %v1693_v53 = vpop.f32.mrf.mxu2  ;;  %v1518_v29 = vpop.f32.mrf.mxu0 }
 0x2ce   : > { %v1694_v18 = vadd.f32 %v1693_v53, %v1605_v43  ;;  %v1607_v42 = vpop.f32.mrf.mxu1  ;;  %v1519_v23 = vadd.f32 %v1518_v29, %v1430_v19 }
 0x2d0   : > { %v1730_v17 = vmax.f32 %v1694_v18, 0.0  ;;  %v1608_v39 = vadd.f32 %v1607_v42, %v1519_v23 }
 0x2d2   : > { %v1749_v44 = vpack.c.bf16 %v1730_v17, %v1729_v15 }
 0x2d4   : > { %v1815_v49 = vsel %vm1768_vm1, %v1749_v44, 0 }
 0x2d5   : > { %v1696_v58 = vpop.f32.mrf.mxu2  ;;  %v1520_v54 = vpop.f32.mrf.mxu0 }
 0x2d6   : > { %v1521_v1 = vadd.f32 %v1520_v54, %v1432_v41  ;;  %v1609_v57 = vpop.f32.mrf.mxu1  ;;  %v1697_v46 = vadd.f32 %v1696_v58, %v1608_v39 }
 0x2d8   : > { %v1610_v26 = vadd.f32 %v1609_v57, %v1521_v1  ;;  %v1731_v14 = vmax.f32 %v1697_v46, 0.0 }
 0x2dd   : > { %v1698_v55 = vpop.f32.mrf.mxu2 }
 0x2de   : > { %v1699_v38 = vadd.f32 %v1698_v55, %v1610_v26 }
 0x2e0   : > { %v1732_v9 = vmax.f32 %v1699_v38, 0.0 }
 0x2e2   : > { %v1750_v61 = vpack.c.bf16 %v1732_v9, %v1731_v14 }
 0x2e4   : > { %v1818_v40 = vsel %vm1768_vm1, %v1750_v61, 0 }
 0x2e5   : > { %1834 = vmatpush.bf16.xpose.msrb.mxu3 %v1818_v40 }
 0x2ed   : > { %1835 = vmatpush.bf16.xpose.msrb.mxu3 %v1815_v49 }
 0x2f5   : > { %1836 = vmatpush.bf16.xpose.msrb.mxu3 %v1812_v51 }
 0x2fd   : > { %1837 = vmatpush.bf16.xpose.msrb.mxu3 %v1809_v2 }
 0x305   : > { %1838 = vmatpush.bf16.xpose.msrb.mxu3 %v1806_v0 }
 0x30d   : > { %1839 = vmatpush.bf16.xpose.msrb.mxu3 %v1803_v62 }
 0x314   : > { %v1761_v52 = vpop.permute.xlu0 %1760 }
 0x315   : > { %1840 = vmatpush.bf16.xpose.msrb.mxu3 %v1800_v32 }
 0x31c   : > { %v1756_v20 = vpop.permute.xlu0 %1755 }
 0x31d   : > { %1841 = vmatpush.bf16.xpose.msrb.mxu3 %v1797_v25 }
 0x324   : > { %2254 = vmatmul.msk.bf16.vlgmr.msrb.gmra.mxu3 %vm1768_vm1, %v3472_v59 }
 0x327   : > { %v1829_v47 = vpop.f32.mrf.mxu3 }
 0x328   : > { %v1830_v37 = vadd.f32 %v1829_v47, %v1756_v20 }
 0x32f   : > { %v1831_v60 = vpop.f32.mrf.mxu3 }
 0x330   : > { %v1832_v35 = vadd.f32 %v1831_v60, %v1761_v52 }
 0x332   : > { %v1849_v28 = vsel %vm1848_vm2, %v1832_v35, -inf }
 0x333   : > { %v1850_v63 = vmax.f32 %v1830_v37, %v1849_v28 }
 0x335   : > { %v1851_v48 = vrot.slane %v1850_v63, 4 }
 0x337   : > { %v1852_v34 = vmax.f32 %v1850_v63, %v1851_v48 }
 0x339   : > { %v1853_v8 = vrot.slane %v1852_v34, 2 }
 0x33b   : > { %v1854_v50 = vmax.f32 %v1852_v34, %v1853_v8 }
 0x33d   : > { %v1855_v13 = vrot.slane %v1854_v50, 1 }
 0x33f   : > { %v1856_v33 = vmax.f32 %v1854_v50, %v1855_v13 }
 0x341   : > { %v1865_v30 = vsub.f32 %v1830_v37, %v1856_v33  ;;  %v1867_v5 = vsub.f32 %v1832_v35, %v1856_v33 }
 0x343   : > { %v1869_v59 = vmul.f32 1.442695, %v1865_v30  ;;  %v1873_v7 = vmul.f32 1.442695, %v1867_v5 }
 0x345   : > { %2414 = vpow2.f32 %v1869_v59 }
 0x346   : > { %2416 = vpow2.f32 %v1873_v7 }
 0x34b   : > { %v2415_v10 = vpop.eup %2414 }
 0x34c   : > { %v2417_v4 = vpop.eup %2416 }
 0x34d   : > { %v1877_v45 = vsel %vm1848_vm2, %v2417_v4, 0.0 }
 0x34e   : > { %v1878_v6 = vadd.f32 %v2415_v10, %v1877_v45 }
 0x350   : > { %v1879_v21 = vrot.slane %v1878_v6, 4 }
 0x352   : > { %v1880_v31 = vadd.f32 %v1879_v21, %v1878_v6 }
 0x354   : > { %v1881_v12 = vrot.slane %v1880_v31, 2 }
 0x356   : > { %v1882_v36 = vadd.f32 %v1881_v12, %v1880_v31 }
 0x358   : > { %v1883_v22 = vrot.slane %v1882_v36, 1 }
 0x35a   : > { %v1884_v16 = vadd.f32 %v1883_v22, %v1882_v36 }
 0x35c   : > { %2418 = vlog2.f32 %v1884_v16 }
 0x362   : > { %v2419_v24 = vpop.eup %2418 }
 0x363   : > { %v1894_v43 = vmul.f32 0.6931472, %v2419_v24 }
 0x365   : > { %v1897_v53 = vsub.f32 %v1865_v30, %v1894_v43  ;;  %v1899_v27 = vsub.f32 %v1867_v5, %v1894_v43 }
 0x367   : > { %1901 = vst [vmem:[%s3504_s29] sm:$0xff] %v1897_v53 }
 0x368   : > { %1903 = vst [vmem:[%s3504_s29 + $0x10] sm:$0x3] %v1899_v27 }
 0x3a7   : > { %v1843_v56 = vpop.f32.mrf.mxu3 }
 0x3a8   : > { %v1844_v15 = vadd.f32 %v1843_v56, %v1756_v20 }
 0x3af   : > { %v1845_v18 = vpop.f32.mrf.mxu3 }
 0x3b0   : > { %v1846_v29 = vadd.f32 %v1845_v18, %v1761_v52 }
 0x3b2   : > { %v1857_v17 = vsel %vm1848_vm2, %v1846_v29, -inf }
 0x3b3   : > { %v1858_v42 = vmax.f32 %v1844_v15, %v1857_v17 }
 0x3b5   : > { %v1859_v44 = vrot.slane %v1858_v42, 4 }
 0x3b7   : > { %v1860_v3 = vmax.f32 %v1858_v42, %v1859_v44 }
 0x3b9   : > { %v1861_v19 = vrot.slane %v1860_v3, 2 }
 0x3bb   : > { %v1862_v58 = vmax.f32 %v1860_v3, %v1861_v19 }
 0x3bd   : > { %v1863_v11 = vrot.slane %v1862_v58, 1 }
 0x3bf   : > { %v1864_v41 = vmax.f32 %v1862_v58, %v1863_v11 }
 0x3c1   : > { %v1866_v23 = vsub.f32 %v1844_v15, %v1864_v41  ;;  %v1868_v54 = vsub.f32 %v1846_v29, %v1864_v41 }
 0x3c3   : > { %v1871_v1 = vmul.f32 1.442695, %v1866_v23  ;;  %v1875_v39 = vmul.f32 1.442695, %v1868_v54 }
 0x3c5   : > { %2420 = vpow2.f32 %v1871_v1 }
 0x3c6   : > { %2422 = vpow2.f32 %v1875_v39 }
 0x3cb   : > { %v2421_v57 = vpop.eup %2420 }
 0x3cc   : > { %v2423_v46 = vpop.eup %2422 }
 0x3cd   : > { %v1885_v26 = vsel %vm1848_vm2, %v2423_v46, 0.0 }
 0x3ce   : > { %v1886_v55 = vadd.f32 %v2421_v57, %v1885_v26 }
 0x3d0   : > { %v1887_v38 = vrot.slane %v1886_v55, 4 }
 0x3d2   : > { %v1888_v14 = vadd.f32 %v1887_v38, %v1886_v55 }
 0x3d4   : > { %v1889_v9 = vrot.slane %v1888_v14, 2 }
 0x3d6   : > { %v1890_v61 = vadd.f32 %v1889_v9, %v1888_v14 }
 0x3d8   : > { %v1891_v40 = vrot.slane %v1890_v61, 1 }
 0x3da   : > { %v1892_v49 = vadd.f32 %v1891_v40, %v1890_v61 }
 0x3dc   : > { %2424 = vlog2.f32 %v1892_v49 }
 0x3e2   : > { %v2425_v51 = vpop.eup %2424 }
 0x3e3   : > { %v1896_v2 = vmul.f32 0.6931472, %v2425_v51 }
 0x3e4   : > { %1912 = sbr.rel (!%p2701_p11) target bundleno = 1033 (0x409), region = 56 }
 0x3e5   : > { %v1898_v0 = vsub.f32 %v1866_v23, %v1896_v2  ;;  %v1900_v62 = vsub.f32 %v1868_v54, %v1896_v2 }
 0x3e7   : > { %1902 = vst [vmem:[%s3504_s29 + $0x8] sm:$0xff] %v1898_v0 }
 0x3e8   : > { %1904 = vst [vmem:[%s3504_s29 + $0x18] sm:$0x3] %v1900_v62 }
 0x3e9   : > { %s3615_s25 = smov (!%p1915_p6, %s1914_s25), 2 }
 0x3ea   : > { %s2257_s8 = sshll.u32 %s3615_s25, 4 }
 0x3eb   : > { %s1918_s17 = ssub.s32 32, %s2257_s8 }
 0x3ec   : > { %s1919_s10 = sshll.u32 %s1918_s17, 4 }
 0x3ed   : > { %1920 = vsyncadd %s1906_s13, %s1919_s10  ;;  %p3521_p13 = scmp.ne.s32.totalorder %s2257_s8, 0  ;;  %s2315_s2 = sshll.u32 %s2670_s22, 4 }
 0x3ee   : > { %s1923_s7 = scalar_lea.hbm %s3583_s5, %s2315_s2  ;;  %s2260_s14 = sshll.u32 %s3615_s25, 3 }
 0x3ef   : > { %s1926_s16 = sshll.u32 %s3504_s29, 4  ;;  %s1928_s28 = sshll.u32 %s1923_s7, 4  ;;  %s3531_s16 = int_to_ptr.vmem [resolvable:$true] %s1926_s16  ;;  %s3533_s28 = int_to_ptr.hbm [resolvable:$true] %s1928_s28 }
 0x3f0   : > { %s2317_s23 = sshll.u32 %s3615_s25, 8  ;;  %s2525_s9 = sshra.s32 %s3531_s16, 4  ;;  %s2526_s9 = int_to_ptr.vmem [resolvable:$true] %s2525_s9 }
 0x3f1   : > { %s2527_s26 = sshrl.u32 %s2317_s23, 4  ;;  %s2616_s22 = smov [#allocation8]  }
 0x3f2   : > { %s2532_s12 = scalar_lea.vmem %s2526_s9, %s2527_s26  ;;  %s2536_s8 = scalar_lea.vmem %s2616_s22, 64 }
 0x3f3   : > { %p2533_p11 = scmp.ne.s32.totalorder %s2526_s9, %s2532_s12  ;;  %p2538_p10 = scmp.lt.s32.totalorder %s2536_s8, %s2532_s12 }
 0x3f5   : > { %p2534_p2 = pnand %p2533_p11, %p3521_p13 }
 0x3f7   : > { %p2535_p7 = pneg %p2534_p2 }
 0x3f9   : > { %p2540_p1 = pnand %p2538_p10, %p2535_p7 }
 0x3fb   : > { %2543 = shalt.err (!%p2540_p1)
}
 0x3fc   : > { %s2544_s29 = sshra.s32 %s3533_s28, 4  ;;  %s2555_s15 = scalar_lea.hbm %s3583_s5, 48  ;;  %s2545_s29 = int_to_ptr.hbm [resolvable:$true] %s2544_s29 }
 0x3fd   : > { %s2551_s17 = scalar_lea.hbm %s2545_s29, %s2527_s26  ;;  %p2556_p8 = scmp.lt.s32.totalorder %s2545_s29, %s3583_s5 }
 0x3fe   : > { %p2552_p0 = scmp.ne.s32.totalorder %s2545_s29, %s2551_s17  ;;  %p2557_p9 = scmp.lt.s32.totalorder %s2555_s15, %s2551_s17 }
 0x400   : > { %p2553_p3 = pnand %p2552_p0, %p3521_p13  ;;  %p2558_p4 = por %p2557_p9, %p2556_p8 }
 0x402   : > { %p2554_p5 = pneg %p2553_p3 }
 0x404   : > { %p2559_p12 = pnand %p2558_p4, %p2554_p5 }
 0x406   : > { %2562 = shalt.err (!%p2559_p12)
}
 0x407   : > { %s2617_s9 = smov 256   ;;  %s2618_s26 = smov 384  }
 0x408   : > { %1934 = dma.vmem_to_hbm [thread:$0]  (%p3521_p13), %s3531_s16, %s2317_s23, %s3533_s28, %s1906_s13, %s2617_s9, %s2618_s26, %s2260_s14  }
 0x409 PF: > { %s1943_s12 = sand.u32 1, %s2594_s18   ;;  %p3604_p6 = scmp.ne.s32.totalorder %s3593_s6, 0 }
 0x40a   : > { %p3605_p11 = scmp.ge.s32.totalorder %s2606_s21, 2  ;;  %s1944_s22 = scalar_lea.sflag [#allocation4], %s1943_s12 }
 0x40c   : > { %p2363_p2 = pnand %p3605_p11, %p3604_p6 }
 0x40e   : > { %p2364_p7 = pneg %p2363_p2 }
 0x410   : > { %2589 = dma.done.wait (%p2364_p7), %s1944_s22, 512  }
 0x411   : > { %2591 = vsyncadd (%p2364_p7), %s1944_s22, 4294966784  ;;  %p19_p10 = scmp.ge.s32.totalorder %s2674_s24, 4   ;;  %s3606_s18 = smov %s2598_s19 }
 0x412   : > { %s3607_s19 = smov %s2602_s20  ;;  %s3608_s20 = smov %s2686_s27 }
 0x413   : > { %s3609_s21 = smov %s2674_s24  ;;  %21 = sbr.rel (!%p19_p10) target bundleno = 9 (0x9), region = 93 }
 0x418   :  { %1950 = vsyncpa [#allocation3], 1 }
 0x419   :  { %1952 = vsyncpa [#allocation3 + $0x1], 1 }
 0x41a   :  { %1953 = vsyncpa [#allocation6], 1 }
 0x41b   :  { %1954 = vsyncpa [#allocation4], 1 }
 0x41c   :  { %1956 = vsyncpa [#allocation4 + $0x1], 1 }

</bundles_post_ra>
